<compile_context>
chip_gen: v7x
topology: tpu7x:2x2x1
jax: 0.10.0
libtpu: 0.0.40
codegen_flags: <defaults>
</compile_context>

<pallas_src>
import math

import jax
import jax.numpy as jnp
from jax import lax
from jax.experimental import pallas as pl
from jax.experimental.pallas import tpu as pltpu

# ---- small config consistent with ModelArgs semantics ----
DIM = 32
N_HEADS = 4
HEAD_DIM = DIM // N_HEADS
BATCH = 2
SEQ = 8
PREFIX_LEN = 8


# ---------------------------------------------------------------------------
# Fused Pallas kernel: whole Attention.forward for one batch element
# ---------------------------------------------------------------------------
def _fused_attention_kernel(x_ref, p_ref, w_ref, wo_ref, cos_ref, sin_ref,
                            gate_ref, o_ref):
    """x_ref:(1,S,DIM) p_ref:(1,P,DIM) w_ref:(5*DIM,DIM)=[wq;wk;wv;wq_swap;wk_swap]
    wo_ref:(DIM,DIM) cos_ref/sin_ref:(S,DIM) gate_ref:(1,H) o_ref:(1,S,DIM)."""
    x_b = x_ref[0]          # (S, DIM)
    p_b = p_ref[0]          # (P, DIM)
    w_all = w_ref[...]      # (5*DIM, DIM), torch Linear layout (out, in)
    wo = wo_ref[...]        # (DIM, DIM)

    # Contract directly on the weights' in_features axis (trans_b matmul);
    # no wrapper transpose, no extra HBM copy.
    dn = (((1,), (1,)), ((), ()))

    # Fused projections: one MXU pass for x (q,k,v + pair-swapped q,k for RoPE),
    # one for the prefix using only the [wk; wv] row-band (no wasted columns).
    proj = lax.dot_general(x_b, w_all, dn, preferred_element_type=jnp.float32)     # (S, 5*DIM)
    pproj = lax.dot_general(p_b, w_all[DIM:3 * DIM], dn,
                            preferred_element_type=jnp.float32)                    # (P, 2*DIM)

    q = proj[:, 0:DIM]
    k = proj[:, DIM:2 * DIM]
    v = proj[:, 2 * DIM:3 * DIM]
    q_sw = proj[:, 3 * DIM:4 * DIM]       # q with (real, imag) lanes swapped
    k_sw = proj[:, 4 * DIM:5 * DIM]
    pk = pproj[:, 0:DIM]                  # prefix k/v: no rotary (matches torch module)
    pv = pproj[:, DIM:2 * DIM]

    # In-kernel RoPE: purely elementwise (VPU). Pair swap lives in the weight
    # permutation, the (-sin, +sin) signs live in sin_ref.
    cos = cos_ref[...]
    sin = sin_ref[...]
    scale = 1.0 / math.sqrt(HEAD_DIM)
    q = (q * cos + q_sw * sin) * scale    # fold softmax scale into q once
    k = k * cos + k_sw * sin

    S = q.shape[0]
    rows = lax.broadcasted_iota(jnp.int32, (S, S), 0)
    cols = lax.broadcasted_iota(jnp.int32, (S, S), 1)
    causal = rows >= cols                 # q_len == kv_len (no cache) -> standard causal

    gate_t = jnp.tanh(gate_ref[...])      # (1, H); tanh evaluated once per grid step

    acc = jnp.zeros((S, DIM), jnp.float32)
    for h in range(N_HEADS):              # static unroll; every tile stays 2-D
        sl = slice(h * HEAD_DIM, (h + 1) * HEAD_DIM)
        qh, kh, vh = q[:, sl], k[:, sl], v[:, sl]
        pkh, pvh = pk[:, sl], pv[:, sl]

        # main attention with causal mask (scale already folded into q)
        s_m = lax.dot_general(qh, kh, dn, preferred_element_type=jnp.float32)
        s_m = jnp.where(causal, s_m, -1e30)
        s_m = s_m - jnp.max(s_m, axis=-1, keepdims=True)
        e_m = jnp.exp(s_m)
        o_m = jnp.dot(e_m, vh, preferred_element_type=jnp.float32)
        o_m = o_m / jnp.sum(e_m, axis=-1, keepdims=True)

        # prefix attention (unmasked)
        s_p = lax.dot_general(qh, pkh, dn, preferred_element_type=jnp.float32)
        s_p = s_p - jnp.max(s_p, axis=-1, keepdims=True)
        e_p = jnp.exp(s_p)
        o_p = jnp.dot(e_p, pvh, preferred_element_type=jnp.float32)
        o_p = o_p / jnp.sum(e_p, axis=-1, keepdims=True)

        merged_h = o_m + gate_t[:, h:h + 1] * o_p        # tanh-gated merge, (S, HEAD_DIM)

        # Fold the wo projection per head and accumulate: the only HBM store is
        # the final lane-dense (S, DIM) slab, no per-head partial writebacks.
        acc = acc + lax.dot_general(merged_h, wo[:, sl], dn,
                                    preferred_element_type=jnp.float32)

    o_ref[0] = acc


# ---------------------------------------------------------------------------
# Wrapper: one-time layout plumbing on parameters/constants + single pallas_call
# ---------------------------------------------------------------------------
@jax.jit
def attention_forward(x, prefix, prefix_gate, cos, sin, params):
    B, S, _ = x.shape
    P = prefix.shape[1]

    # Pair-swap row permutation of wq/wk output features: makes RoPE's complex
    # multiply purely elementwise inside the kernel (no lane shuffles).
    idx = jnp.arange(DIM)
    pair_swap = idx + 1 - 2 * (idx % 2)                                  # [1,0,3,2,...]
    w_all = jnp.concatenate(
        [params["wq"], params["wk"], params["wv"],
         params["wq"][pair_swap], params["wk"][pair_swap]], axis=0)      # (5*DIM, DIM)

    # Expand RoPE tables to the q/k lane layout (layout plumbing, done once).
    cos_full = jnp.tile(jnp.repeat(cos, 2, axis=1), (1, N_HEADS))        # (S, DIM)
    sign = jnp.tile(jnp.array([-1.0, 1.0], jnp.float32), HEAD_DIM // 2)  # (HEAD_DIM,)
    sin_full = jnp.tile(jnp.repeat(sin, 2, axis=1) * sign[None, :], (1, N_HEADS))

    gate2d = prefix_gate.reshape(1, N_HEADS)

    return pl.pallas_call(
        _fused_attention_kernel,
        out_shape=jax.ShapeDtypeStruct((B, S, DIM), jnp.float32),
        grid=(B,),
        in_specs=[
            pl.BlockSpec((1, S, DIM), lambda b: (b, 0, 0)),       # x
            pl.BlockSpec((1, P, DIM), lambda b: (b, 0, 0)),       # prefix
            pl.BlockSpec((5 * DIM, DIM), lambda b: (0, 0)),       # fused qkv(+swap) weights
            pl.BlockSpec((DIM, DIM), lambda b: (0, 0)),           # wo
            pl.BlockSpec((S, DIM), lambda b: (0, 0)),             # RoPE cos
            pl.BlockSpec((S, DIM), lambda b: (0, 0)),             # RoPE sin (signed)
            pl.BlockSpec((1, N_HEADS), lambda b: (0, 0)),         # prefix gate
        ],
        out_specs=pl.BlockSpec((1, S, DIM), lambda b: (b, 0, 0)),
        compiler_params=pltpu.CompilerParams(
            dimension_semantics=("parallel",)),   # batch axis -> both TCs on v7x
    )(x, prefix, w_all, params["wo"], cos_full, sin_full, gate2d)


# ---------------------------------------------------------------------------
# RoPE tables + pure-JAX reference (mirrors the PyTorch forward) for verification
# ---------------------------------------------------------------------------
def precompute_freqs(dim, seqlen, theta=10000.0):
    freqs = 1.0 / (theta ** (jnp.arange(0, dim, 2, dtype=jnp.float32) / dim))
    t = jnp.arange(seqlen, dtype=jnp.float32)
    angles = jnp.outer(t, freqs)              # (S, D/2)
    return jnp.cos(angles), jnp.sin(angles)


def apply_rotary(x, cos, sin):
    # x: (B, S, H, D); cos/sin: (S, D/2). Matches torch view_as_complex pairing.
    B, S, H, D = x.shape
    x_ = x.reshape(B, S, H, D // 2, 2)
    xr, xi = x_[..., 0], x_[..., 1]
    c = cos[None, :, None, :]
    s = sin[None, :, None, :]
    outr = xr * c - xi * s
    outi = xr * s + xi * c
    return jnp.stack([outr, outi], axis=-1).reshape(B, S, H, D)


def reference_forward(x, prefix, prefix_gate, cos, sin, params):
    B, S, _ = x.shape
    xq = (x @ params["wq"].T).reshape(B, S, N_HEADS, HEAD_DIM)
    xk = (x @ params["wk"].T).reshape(B, S, N_HEADS, HEAD_DIM)
    xv = (x @ params["wv"].T).reshape(B, S, N_HEADS, HEAD_DIM)
    xq = apply_rotary(xq, cos, sin)
    xk = apply_rotary(xk, cos, sin)
    pk = (prefix @ params["wk"].T).reshape(B, PREFIX_LEN, N_HEADS, HEAD_DIM)
    pv = (prefix @ params["wv"].T).reshape(B, PREFIX_LEN, N_HEADS, HEAD_DIM)

    q = xq.transpose(0, 2, 1, 3)
    k = xk.transpose(0, 2, 1, 3)
    v = xv.transpose(0, 2, 1, 3)
    pkt = pk.transpose(0, 2, 1, 3)
    pvt = pv.transpose(0, 2, 1, 3)

    scale = 1.0 / math.sqrt(HEAD_DIM)
    s = jnp.einsum("bhqd,bhkd->bhqk", q, k) * scale
    causal = jnp.tril(jnp.ones((S, S), dtype=bool))
    s = jnp.where(causal[None, None], s, -1e30)
    s = s - jnp.max(s, axis=-1, keepdims=True)
    p = jnp.exp(s)
    p = p / jnp.sum(p, axis=-1, keepdims=True)
    out = jnp.einsum("bhqk,bhkd->bhqd", p, v)

    sp = jnp.einsum("bhqd,bhkd->bhqk", q, pkt) * scale
    sp = sp - jnp.max(sp, axis=-1, keepdims=True)
    pp = jnp.exp(sp)
    pp = pp / jnp.sum(pp, axis=-1, keepdims=True)
    pout = jnp.einsum("bhqk,bhkd->bhqd", pp, pvt)

    gate = jnp.tanh(prefix_gate).reshape(1, N_HEADS, 1, 1)
    out = out + gate * pout
    out = out.transpose(0, 2, 1, 3).reshape(B, S, N_HEADS * HEAD_DIM)
    return out @ params["wo"].T


# ---------------------------------------------------------------------------
def init_params(key):
    """Deterministic kaiming_uniform-like init (a=sqrt(5) -> bound = 1/sqrt(fan_in))."""
    ks = jax.random.split(key, 4)

    def lin(k, out_f, in_f):
        bound = 1.0 / math.sqrt(in_f)
        return jax.random.uniform(k, (out_f, in_f), jnp.float32, -bound, bound)

    return {
        "wq": lin(ks[0], N_HEADS * HEAD_DIM, DIM),
        "wk": lin(ks[1], N_HEADS * HEAD_DIM, DIM),
        "wv": lin(ks[2], N_HEADS * HEAD_DIM, DIM),
        "wo": lin(ks[3], DIM, N_HEADS * HEAD_DIM),
    }


if __name__ == "__main__":
    key = jax.random.PRNGKey(0)
    k_x, k_p, k_g, k_w = jax.random.split(key, 4)

    x = jax.random.normal(k_x, (BATCH, SEQ, DIM), jnp.float32)
    prefix = jax.random.normal(k_p, (BATCH, PREFIX_LEN, DIM), jnp.float32)
    prefix_gate = 0.1 * jax.random.normal(k_g, (N_HEADS,), jnp.float32)
    params = init_params(k_w)
    cos, sin = precompute_freqs(HEAD_DIM, SEQ)

    # TODO(synk): kv-cache (start_pos > 0), flash-attn branch, LoRA/bias_tuning and
    # model-parallel all-reduce are not covered; this is the no-cache causal path.
    out = attention_forward(x, prefix, prefix_gate, cos, sin, params)
    out = jax.block_until_ready(out)

    ref = reference_forward(x, prefix, prefix_gate, cos, sin, params)
    assert out.shape == (BATCH, SEQ, DIM)
    assert jnp.allclose(out, ref, rtol=1e-4, atol=1e-4), (
        float(jnp.max(jnp.abs(out - ref))))

    print("KERNEL_OK")
</pallas_src>

<mosaic_0001>
module attributes {stable_mosaic.version = 11 : i64} {
  func.func @_fused_attention_kernel(%arg0: i32, %arg1: memref<1x8x32xf32, #tpu.memory_space<vmem>>, %arg2: memref<1x8x32xf32, #tpu.memory_space<vmem>>, %arg3: memref<160x32xf32, #tpu.memory_space<vmem>>, %arg4: memref<32x32xf32, #tpu.memory_space<vmem>>, %arg5: memref<8x32xf32, #tpu.memory_space<vmem>>, %arg6: memref<8x32xf32, #tpu.memory_space<vmem>>, %arg7: memref<1x4xf32, #tpu.memory_space<vmem>>, %arg8: memref<1x8x32xf32, #tpu.memory_space<vmem>>) attributes {dimension_semantics = [#tpu.dimension_semantics<parallel>], iteration_bounds = array<i64: 2>, scalar_prefetch = 0 : i64, scratch_operands = 0 : i64, tpu.core_type = #tpu.core_type<tc>, window_params = [{transform_indices = @transform_0, window_bounds = array<i64: 1, 8, 32>}, {transform_indices = @transform_1, window_bounds = array<i64: 1, 8, 32>}, {pipeline_mode = #tpu.pipeline_mode<synchronous>, transform_indices = @transform_2, window_bounds = array<i64: 160, 32>}, {pipeline_mode = #tpu.pipeline_mode<synchronous>, transform_indices = @transform_3, window_bounds = array<i64: 32, 32>}, {pipeline_mode = #tpu.pipeline_mode<synchronous>, transform_indices = @transform_4, window_bounds = array<i64: 8, 32>}, {pipeline_mode = #tpu.pipeline_mode<synchronous>, transform_indices = @transform_5, window_bounds = array<i64: 8, 32>}, {pipeline_mode = #tpu.pipeline_mode<synchronous>, transform_indices = @transform_6, window_bounds = array<i64: 1, 4>}, {transform_indices = @transform_7, window_bounds = array<i64: 1, 8, 32>}]} {
    %c0 = arith.constant 0 : index
    %c0_0 = arith.constant 0 : index
    %c0_1 = arith.constant 0 : index
    %0 = vector.load %arg1[%c0, %c0_0, %c0_1] : memref<1x8x32xf32, #tpu.memory_space<vmem>>, vector<1x8x32xf32>
    %1 = vector.shape_cast %0 : vector<1x8x32xf32> to vector<8x32xf32>
    %c0_2 = arith.constant 0 : index
    %c0_3 = arith.constant 0 : index
    %c0_4 = arith.constant 0 : index
    %2 = vector.load %arg2[%c0_2, %c0_3, %c0_4] : memref<1x8x32xf32, #tpu.memory_space<vmem>>, vector<1x8x32xf32>
    %3 = vector.shape_cast %2 : vector<1x8x32xf32> to vector<8x32xf32>
    %c0_5 = arith.constant 0 : index
    %c0_6 = arith.constant 0 : index
    %4 = vector.load %arg3[%c0_5, %c0_6] : memref<160x32xf32, #tpu.memory_space<vmem>>, vector<160x32xf32>
    %c0_7 = arith.constant 0 : index
    %c0_8 = arith.constant 0 : index
    %5 = vector.load %arg4[%c0_7, %c0_8] : memref<32x32xf32, #tpu.memory_space<vmem>>, vector<32x32xf32>
    %cst = arith.constant dense<0.000000e+00> : vector<8x160xf32>
    %6 = tpu.matmul %1, %4, %cst {dimension_numbers = #tpu.dot_dimension_numbers<[1], [1], [0], [0], [0, 0, 1, 0], [], []>} : vector<8x32xf32>, vector<160x32xf32>, vector<8x160xf32> -> vector<8x160xf32>
    %7 = vector.extract_strided_slice %4 {offsets = [32, 0], sizes = [64, 32], strides = [1, 1]} : vector<160x32xf32> to vector<64x32xf32>
    %cst_9 = arith.constant dense<0.000000e+00> : vector<8x64xf32>
    %8 = tpu.matmul %3, %7, %cst_9 {dimension_numbers = #tpu.dot_dimension_numbers<[1], [1], [0], [0], [0, 0, 1, 0], [], []>} : vector<8x32xf32>, vector<64x32xf32>, vector<8x64xf32> -> vector<8x64xf32>
    %9 = vector.extract_strided_slice %6 {offsets = [0, 0], sizes = [8, 32], strides = [1, 1]} : vector<8x160xf32> to vector<8x32xf32>
    %10 = vector.extract_strided_slice %6 {offsets = [0, 32], sizes = [8, 32], strides = [1, 1]} : vector<8x160xf32> to vector<8x32xf32>
    %11 = vector.extract_strided_slice %6 {offsets = [0, 64], sizes = [8, 32], strides = [1, 1]} : vector<8x160xf32> to vector<8x32xf32>
    %12 = vector.extract_strided_slice %6 {offsets = [0, 96], sizes = [8, 32], strides = [1, 1]} : vector<8x160xf32> to vector<8x32xf32>
    %13 = vector.extract_strided_slice %6 {offsets = [0, 128], sizes = [8, 32], strides = [1, 1]} : vector<8x160xf32> to vector<8x32xf32>
    %14 = vector.extract_strided_slice %8 {offsets = [0, 0], sizes = [8, 32], strides = [1, 1]} : vector<8x64xf32> to vector<8x32xf32>
    %15 = vector.extract_strided_slice %8 {offsets = [0, 32], sizes = [8, 32], strides = [1, 1]} : vector<8x64xf32> to vector<8x32xf32>
    %c0_10 = arith.constant 0 : index
    %c0_11 = arith.constant 0 : index
    %16 = vector.load %arg5[%c0_10, %c0_11] : memref<8x32xf32, #tpu.memory_space<vmem>>, vector<8x32xf32>
    %c0_12 = arith.constant 0 : index
    %c0_13 = arith.constant 0 : index
    %17 = vector.load %arg6[%c0_12, %c0_13] : memref<8x32xf32, #tpu.memory_space<vmem>>, vector<8x32xf32>
    %18 = arith.mulf %9, %16 : vector<8x32xf32>
    %19 = arith.mulf %12, %17 : vector<8x32xf32>
    %20 = arith.addf %18, %19 : vector<8x32xf32>
    %cst_14 = arith.constant 0.353553385 : f32
    %21 = vector.broadcast %cst_14 : f32 to vector<8x32xf32>
    %22 = arith.mulf %20, %21 : vector<8x32xf32>
    %23 = arith.mulf %10, %16 : vector<8x32xf32>
    %24 = arith.mulf %13, %17 : vector<8x32xf32>
    %25 = arith.addf %23, %24 : vector<8x32xf32>
    %26 = tpu.iota {dimensions = array<i32: 0>} : vector<8x8xi32>
    %27 = tpu.iota {dimensions = array<i32: 1>} : vector<8x8xi32>
    %28 = arith.cmpi sge, %26, %27 : vector<8x8xi32>
    %c0_15 = arith.constant 0 : index
    %c0_16 = arith.constant 0 : index
    %29 = vector.load %arg7[%c0_15, %c0_16] : memref<1x4xf32, #tpu.memory_space<vmem>>, vector<1x4xf32>
    %30 = math.tanh %29 : vector<1x4xf32>
    %cst_17 = arith.constant 0.000000e+00 : f32
    %31 = vector.broadcast %cst_17 : f32 to vector<8x32xf32>
    %32 = vector.extract_strided_slice %22 {offsets = [0, 0], sizes = [8, 8], strides = [1, 1]} : vector<8x32xf32> to vector<8x8xf32>
    %33 = vector.extract_strided_slice %25 {offsets = [0, 0], sizes = [8, 8], strides = [1, 1]} : vector<8x32xf32> to vector<8x8xf32>
    %34 = vector.extract_strided_slice %11 {offsets = [0, 0], sizes = [8, 8], strides = [1, 1]} : vector<8x32xf32> to vector<8x8xf32>
    %35 = vector.extract_strided_slice %14 {offsets = [0, 0], sizes = [8, 8], strides = [1, 1]} : vector<8x32xf32> to vector<8x8xf32>
    %36 = vector.extract_strided_slice %15 {offsets = [0, 0], sizes = [8, 8], strides = [1, 1]} : vector<8x32xf32> to vector<8x8xf32>
    %cst_18 = arith.constant dense<0.000000e+00> : vector<8x8xf32>
    %37 = tpu.matmul %32, %33, %cst_18 {dimension_numbers = #tpu.dot_dimension_numbers<[1], [1], [0], [0], [0, 0, 1, 0], [], []>} : vector<8x8xf32>, vector<8x8xf32>, vector<8x8xf32> -> vector<8x8xf32>
    %cst_19 = arith.constant -1.000000e+30 : f32
    %38 = vector.broadcast %cst_19 : f32 to vector<8x8xf32>
    %39 = arith.select %28, %37, %38 : vector<8x8xi1>, vector<8x8xf32>
    %cst_20 = arith.constant dense<0xFF800000> : vector<8xf32>
    %40 = vector.multi_reduction <maximumf>, %39, %cst_20 [1] : vector<8x8xf32> to vector<8xf32>
    %41 = vector.shape_cast %40 : vector<8xf32> to vector<8x1xf32>
    %42 = vector.broadcast %41 : vector<8x1xf32> to vector<8x8xf32>
    %43 = arith.subf %39, %42 : vector<8x8xf32>
    %44 = math.exp %43 : vector<8x8xf32>
    %cst_21 = arith.constant dense<0.000000e+00> : vector<8x8xf32>
    %45 = tpu.matmul %44, %34, %cst_21 {dimension_numbers = #tpu.dot_dimension_numbers<[1], [0], [0], [1], [0, 0, 1, 1], [], []>} : vector<8x8xf32>, vector<8x8xf32>, vector<8x8xf32> -> vector<8x8xf32>
    %cst_22 = arith.constant dense<0.000000e+00> : vector<8xf32>
    %46 = vector.multi_reduction <add>, %44, %cst_22 [1] : vector<8x8xf32> to vector<8xf32>
    %47 = vector.shape_cast %46 : vector<8xf32> to vector<8x1xf32>
    %48 = vector.broadcast %47 : vector<8x1xf32> to vector<8x8xf32>
    %49 = arith.divf %45, %48 : vector<8x8xf32>
    %cst_23 = arith.constant dense<0.000000e+00> : vector<8x8xf32>
    %50 = tpu.matmul %32, %35, %cst_23 {dimension_numbers = #tpu.dot_dimension_numbers<[1], [1], [0], [0], [0, 0, 1, 0], [], []>} : vector<8x8xf32>, vector<8x8xf32>, vector<8x8xf32> -> vector<8x8xf32>
    %cst_24 = arith.constant dense<0xFF800000> : vector<8xf32>
    %51 = vector.multi_reduction <maximumf>, %50, %cst_24 [1] : vector<8x8xf32> to vector<8xf32>
    %52 = vector.shape_cast %51 : vector<8xf32> to vector<8x1xf32>
    %53 = vector.broadcast %52 : vector<8x1xf32> to vector<8x8xf32>
    %54 = arith.subf %50, %53 : vector<8x8xf32>
    %55 = math.exp %54 : vector<8x8xf32>
    %cst_25 = arith.constant dense<0.000000e+00> : vector<8x8xf32>
    %56 = tpu.matmul %55, %36, %cst_25 {dimension_numbers = #tpu.dot_dimension_numbers<[1], [0], [0], [1], [0, 0, 1, 1], [], []>} : vector<8x8xf32>, vector<8x8xf32>, vector<8x8xf32> -> vector<8x8xf32>
    %cst_26 = arith.constant dense<0.000000e+00> : vector<8xf32>
    %57 = vector.multi_reduction <add>, %55, %cst_26 [1] : vector<8x8xf32> to vector<8xf32>
    %58 = vector.shape_cast %57 : vector<8xf32> to vector<8x1xf32>
    %59 = vector.broadcast %58 : vector<8x1xf32> to vector<8x8xf32>
    %60 = arith.divf %56, %59 : vector<8x8xf32>
    %61 = vector.extract_strided_slice %30 {offsets = [0, 0], sizes = [1, 1], strides = [1, 1]} : vector<1x4xf32> to vector<1x1xf32>
    %62 = vector.broadcast %61 : vector<1x1xf32> to vector<8x8xf32>
    %63 = arith.mulf %62, %60 : vector<8x8xf32>
    %64 = arith.addf %49, %63 : vector<8x8xf32>
    %65 = vector.extract_strided_slice %5 {offsets = [0, 0], sizes = [32, 8], strides = [1, 1]} : vector<32x32xf32> to vector<32x8xf32>
    %cst_27 = arith.constant dense<0.000000e+00> : vector<8x32xf32>
    %66 = tpu.matmul %64, %65, %cst_27 {dimension_numbers = #tpu.dot_dimension_numbers<[1], [1], [0], [0], [0, 0, 1, 0], [], []>} : vector<8x8xf32>, vector<32x8xf32>, vector<8x32xf32> -> vector<8x32xf32>
    %67 = arith.addf %31, %66 : vector<8x32xf32>
    %68 = vector.extract_strided_slice %22 {offsets = [0, 8], sizes = [8, 8], strides = [1, 1]} : vector<8x32xf32> to vector<8x8xf32>
    %69 = vector.extract_strided_slice %25 {offsets = [0, 8], sizes = [8, 8], strides = [1, 1]} : vector<8x32xf32> to vector<8x8xf32>
    %70 = vector.extract_strided_slice %11 {offsets = [0, 8], sizes = [8, 8], strides = [1, 1]} : vector<8x32xf32> to vector<8x8xf32>
    %71 = vector.extract_strided_slice %14 {offsets = [0, 8], sizes = [8, 8], strides = [1, 1]} : vector<8x32xf32> to vector<8x8xf32>
    %72 = vector.extract_strided_slice %15 {offsets = [0, 8], sizes = [8, 8], strides = [1, 1]} : vector<8x32xf32> to vector<8x8xf32>
    %cst_28 = arith.constant dense<0.000000e+00> : vector<8x8xf32>
    %73 = tpu.matmul %68, %69, %cst_28 {dimension_numbers = #tpu.dot_dimension_numbers<[1], [1], [0], [0], [0, 0, 1, 0], [], []>} : vector<8x8xf32>, vector<8x8xf32>, vector<8x8xf32> -> vector<8x8xf32>
    %cst_29 = arith.constant -1.000000e+30 : f32
    %74 = vector.broadcast %cst_29 : f32 to vector<8x8xf32>
    %75 = arith.select %28, %73, %74 : vector<8x8xi1>, vector<8x8xf32>
    %cst_30 = arith.constant dense<0xFF800000> : vector<8xf32>
    %76 = vector.multi_reduction <maximumf>, %75, %cst_30 [1] : vector<8x8xf32> to vector<8xf32>
    %77 = vector.shape_cast %76 : vector<8xf32> to vector<8x1xf32>
    %78 = vector.broadcast %77 : vector<8x1xf32> to vector<8x8xf32>
    %79 = arith.subf %75, %78 : vector<8x8xf32>
    %80 = math.exp %79 : vector<8x8xf32>
    %cst_31 = arith.constant dense<0.000000e+00> : vector<8x8xf32>
    %81 = tpu.matmul %80, %70, %cst_31 {dimension_numbers = #tpu.dot_dimension_numbers<[1], [0], [0], [1], [0, 0, 1, 1], [], []>} : vector<8x8xf32>, vector<8x8xf32>, vector<8x8xf32> -> vector<8x8xf32>
    %cst_32 = arith.constant dense<0.000000e+00> : vector<8xf32>
    %82 = vector.multi_reduction <add>, %80, %cst_32 [1] : vector<8x8xf32> to vector<8xf32>
    %83 = vector.shape_cast %82 : vector<8xf32> to vector<8x1xf32>
    %84 = vector.broadcast %83 : vector<8x1xf32> to vector<8x8xf32>
    %85 = arith.divf %81, %84 : vector<8x8xf32>
    %cst_33 = arith.constant dense<0.000000e+00> : vector<8x8xf32>
    %86 = tpu.matmul %68, %71, %cst_33 {dimension_numbers = #tpu.dot_dimension_numbers<[1], [1], [0], [0], [0, 0, 1, 0], [], []>} : vector<8x8xf32>, vector<8x8xf32>, vector<8x8xf32> -> vector<8x8xf32>
    %cst_34 = arith.constant dense<0xFF800000> : vector<8xf32>
    %87 = vector.multi_reduction <maximumf>, %86, %cst_34 [1] : vector<8x8xf32> to vector<8xf32>
    %88 = vector.shape_cast %87 : vector<8xf32> to vector<8x1xf32>
    %89 = vector.broadcast %88 : vector<8x1xf32> to vector<8x8xf32>
    %90 = arith.subf %86, %89 : vector<8x8xf32>
    %91 = math.exp %90 : vector<8x8xf32>
    %cst_35 = arith.constant dense<0.000000e+00> : vector<8x8xf32>
    %92 = tpu.matmul %91, %72, %cst_35 {dimension_numbers = #tpu.dot_dimension_numbers<[1], [0], [0], [1], [0, 0, 1, 1], [], []>} : vector<8x8xf32>, vector<8x8xf32>, vector<8x8xf32> -> vector<8x8xf32>
    %cst_36 = arith.constant dense<0.000000e+00> : vector<8xf32>
    %93 = vector.multi_reduction <add>, %91, %cst_36 [1] : vector<8x8xf32> to vector<8xf32>
    %94 = vector.shape_cast %93 : vector<8xf32> to vector<8x1xf32>
    %95 = vector.broadcast %94 : vector<8x1xf32> to vector<8x8xf32>
    %96 = arith.divf %92, %95 : vector<8x8xf32>
    %97 = vector.extract_strided_slice %30 {offsets = [0, 1], sizes = [1, 1], strides = [1, 1]} : vector<1x4xf32> to vector<1x1xf32>
    %98 = vector.broadcast %97 : vector<1x1xf32> to vector<8x8xf32>
    %99 = arith.mulf %98, %96 : vector<8x8xf32>
    %100 = arith.addf %85, %99 : vector<8x8xf32>
    %101 = vector.extract_strided_slice %5 {offsets = [0, 8], sizes = [32, 8], strides = [1, 1]} : vector<32x32xf32> to vector<32x8xf32>
    %cst_37 = arith.constant dense<0.000000e+00> : vector<8x32xf32>
    %102 = tpu.matmul %100, %101, %cst_37 {dimension_numbers = #tpu.dot_dimension_numbers<[1], [1], [0], [0], [0, 0, 1, 0], [], []>} : vector<8x8xf32>, vector<32x8xf32>, vector<8x32xf32> -> vector<8x32xf32>
    %103 = arith.addf %67, %102 : vector<8x32xf32>
    %104 = vector.extract_strided_slice %22 {offsets = [0, 16], sizes = [8, 8], strides = [1, 1]} : vector<8x32xf32> to vector<8x8xf32>
    %105 = vector.extract_strided_slice %25 {offsets = [0, 16], sizes = [8, 8], strides = [1, 1]} : vector<8x32xf32> to vector<8x8xf32>
    %106 = vector.extract_strided_slice %11 {offsets = [0, 16], sizes = [8, 8], strides = [1, 1]} : vector<8x32xf32> to vector<8x8xf32>
    %107 = vector.extract_strided_slice %14 {offsets = [0, 16], sizes = [8, 8], strides = [1, 1]} : vector<8x32xf32> to vector<8x8xf32>
    %108 = vector.extract_strided_slice %15 {offsets = [0, 16], sizes = [8, 8], strides = [1, 1]} : vector<8x32xf32> to vector<8x8xf32>
    %cst_38 = arith.constant dense<0.000000e+00> : vector<8x8xf32>
    %109 = tpu.matmul %104, %105, %cst_38 {dimension_numbers = #tpu.dot_dimension_numbers<[1], [1], [0], [0], [0, 0, 1, 0], [], []>} : vector<8x8xf32>, vector<8x8xf32>, vector<8x8xf32> -> vector<8x8xf32>
    %cst_39 = arith.constant -1.000000e+30 : f32
    %110 = vector.broadcast %cst_39 : f32 to vector<8x8xf32>
    %111 = arith.select %28, %109, %110 : vector<8x8xi1>, vector<8x8xf32>
    %cst_40 = arith.constant dense<0xFF800000> : vector<8xf32>
    %112 = vector.multi_reduction <maximumf>, %111, %cst_40 [1] : vector<8x8xf32> to vector<8xf32>
    %113 = vector.shape_cast %112 : vector<8xf32> to vector<8x1xf32>
    %114 = vector.broadcast %113 : vector<8x1xf32> to vector<8x8xf32>
    %115 = arith.subf %111, %114 : vector<8x8xf32>
    %116 = math.exp %115 : vector<8x8xf32>
    %cst_41 = arith.constant dense<0.000000e+00> : vector<8x8xf32>
    %117 = tpu.matmul %116, %106, %cst_41 {dimension_numbers = #tpu.dot_dimension_numbers<[1], [0], [0], [1], [0, 0, 1, 1], [], []>} : vector<8x8xf32>, vector<8x8xf32>, vector<8x8xf32> -> vector<8x8xf32>
    %cst_42 = arith.constant dense<0.000000e+00> : vector<8xf32>
    %118 = vector.multi_reduction <add>, %116, %cst_42 [1] : vector<8x8xf32> to vector<8xf32>
    %119 = vector.shape_cast %118 : vector<8xf32> to vector<8x1xf32>
    %120 = vector.broadcast %119 : vector<8x1xf32> to vector<8x8xf32>
    %121 = arith.divf %117, %120 : vector<8x8xf32>
    %cst_43 = arith.constant dense<0.000000e+00> : vector<8x8xf32>
    %122 = tpu.matmul %104, %107, %cst_43 {dimension_numbers = #tpu.dot_dimension_numbers<[1], [1], [0], [0], [0, 0, 1, 0], [], []>} : vector<8x8xf32>, vector<8x8xf32>, vector<8x8xf32> -> vector<8x8xf32>
    %cst_44 = arith.constant dense<0xFF800000> : vector<8xf32>
    %123 = vector.multi_reduction <maximumf>, %122, %cst_44 [1] : vector<8x8xf32> to vector<8xf32>
    %124 = vector.shape_cast %123 : vector<8xf32> to vector<8x1xf32>
    %125 = vector.broadcast %124 : vector<8x1xf32> to vector<8x8xf32>
    %126 = arith.subf %122, %125 : vector<8x8xf32>
    %127 = math.exp %126 : vector<8x8xf32>
    %cst_45 = arith.constant dense<0.000000e+00> : vector<8x8xf32>
    %128 = tpu.matmul %127, %108, %cst_45 {dimension_numbers = #tpu.dot_dimension_numbers<[1], [0], [0], [1], [0, 0, 1, 1], [], []>} : vector<8x8xf32>, vector<8x8xf32>, vector<8x8xf32> -> vector<8x8xf32>
    %cst_46 = arith.constant dense<0.000000e+00> : vector<8xf32>
    %129 = vector.multi_reduction <add>, %127, %cst_46 [1] : vector<8x8xf32> to vector<8xf32>
    %130 = vector.shape_cast %129 : vector<8xf32> to vector<8x1xf32>
    %131 = vector.broadcast %130 : vector<8x1xf32> to vector<8x8xf32>
    %132 = arith.divf %128, %131 : vector<8x8xf32>
    %133 = vector.extract_strided_slice %30 {offsets = [0, 2], sizes = [1, 1], strides = [1, 1]} : vector<1x4xf32> to vector<1x1xf32>
    %134 = vector.broadcast %133 : vector<1x1xf32> to vector<8x8xf32>
    %135 = arith.mulf %134, %132 : vector<8x8xf32>
    %136 = arith.addf %121, %135 : vector<8x8xf32>
    %137 = vector.extract_strided_slice %5 {offsets = [0, 16], sizes = [32, 8], strides = [1, 1]} : vector<32x32xf32> to vector<32x8xf32>
    %cst_47 = arith.constant dense<0.000000e+00> : vector<8x32xf32>
    %138 = tpu.matmul %136, %137, %cst_47 {dimension_numbers = #tpu.dot_dimension_numbers<[1], [1], [0], [0], [0, 0, 1, 0], [], []>} : vector<8x8xf32>, vector<32x8xf32>, vector<8x32xf32> -> vector<8x32xf32>
    %139 = arith.addf %103, %138 : vector<8x32xf32>
    %140 = vector.extract_strided_slice %22 {offsets = [0, 24], sizes = [8, 8], strides = [1, 1]} : vector<8x32xf32> to vector<8x8xf32>
    %141 = vector.extract_strided_slice %25 {offsets = [0, 24], sizes = [8, 8], strides = [1, 1]} : vector<8x32xf32> to vector<8x8xf32>
    %142 = vector.extract_strided_slice %11 {offsets = [0, 24], sizes = [8, 8], strides = [1, 1]} : vector<8x32xf32> to vector<8x8xf32>
    %143 = vector.extract_strided_slice %14 {offsets = [0, 24], sizes = [8, 8], strides = [1, 1]} : vector<8x32xf32> to vector<8x8xf32>
    %144 = vector.extract_strided_slice %15 {offsets = [0, 24], sizes = [8, 8], strides = [1, 1]} : vector<8x32xf32> to vector<8x8xf32>
    %cst_48 = arith.constant dense<0.000000e+00> : vector<8x8xf32>
    %145 = tpu.matmul %140, %141, %cst_48 {dimension_numbers = #tpu.dot_dimension_numbers<[1], [1], [0], [0], [0, 0, 1, 0], [], []>} : vector<8x8xf32>, vector<8x8xf32>, vector<8x8xf32> -> vector<8x8xf32>
    %cst_49 = arith.constant -1.000000e+30 : f32
    %146 = vector.broadcast %cst_49 : f32 to vector<8x8xf32>
    %147 = arith.select %28, %145, %146 : vector<8x8xi1>, vector<8x8xf32>
    %cst_50 = arith.constant dense<0xFF800000> : vector<8xf32>
    %148 = vector.multi_reduction <maximumf>, %147, %cst_50 [1] : vector<8x8xf32> to vector<8xf32>
    %149 = vector.shape_cast %148 : vector<8xf32> to vector<8x1xf32>
    %150 = vector.broadcast %149 : vector<8x1xf32> to vector<8x8xf32>
    %151 = arith.subf %147, %150 : vector<8x8xf32>
    %152 = math.exp %151 : vector<8x8xf32>
    %cst_51 = arith.constant dense<0.000000e+00> : vector<8x8xf32>
    %153 = tpu.matmul %152, %142, %cst_51 {dimension_numbers = #tpu.dot_dimension_numbers<[1], [0], [0], [1], [0, 0, 1, 1], [], []>} : vector<8x8xf32>, vector<8x8xf32>, vector<8x8xf32> -> vector<8x8xf32>
    %cst_52 = arith.constant dense<0.000000e+00> : vector<8xf32>
    %154 = vector.multi_reduction <add>, %152, %cst_52 [1] : vector<8x8xf32> to vector<8xf32>
    %155 = vector.shape_cast %154 : vector<8xf32> to vector<8x1xf32>
    %156 = vector.broadcast %155 : vector<8x1xf32> to vector<8x8xf32>
    %157 = arith.divf %153, %156 : vector<8x8xf32>
    %cst_53 = arith.constant dense<0.000000e+00> : vector<8x8xf32>
    %158 = tpu.matmul %140, %143, %cst_53 {dimension_numbers = #tpu.dot_dimension_numbers<[1], [1], [0], [0], [0, 0, 1, 0], [], []>} : vector<8x8xf32>, vector<8x8xf32>, vector<8x8xf32> -> vector<8x8xf32>
    %cst_54 = arith.constant dense<0xFF800000> : vector<8xf32>
    %159 = vector.multi_reduction <maximumf>, %158, %cst_54 [1] : vector<8x8xf32> to vector<8xf32>
    %160 = vector.shape_cast %159 : vector<8xf32> to vector<8x1xf32>
    %161 = vector.broadcast %160 : vector<8x1xf32> to vector<8x8xf32>
    %162 = arith.subf %158, %161 : vector<8x8xf32>
    %163 = math.exp %162 : vector<8x8xf32>
    %cst_55 = arith.constant dense<0.000000e+00> : vector<8x8xf32>
    %164 = tpu.matmul %163, %144, %cst_55 {dimension_numbers = #tpu.dot_dimension_numbers<[1], [0], [0], [1], [0, 0, 1, 1], [], []>} : vector<8x8xf32>, vector<8x8xf32>, vector<8x8xf32> -> vector<8x8xf32>
    %cst_56 = arith.constant dense<0.000000e+00> : vector<8xf32>
    %165 = vector.multi_reduction <add>, %163, %cst_56 [1] : vector<8x8xf32> to vector<8xf32>
    %166 = vector.shape_cast %165 : vector<8xf32> to vector<8x1xf32>
    %167 = vector.broadcast %166 : vector<8x1xf32> to vector<8x8xf32>
    %168 = arith.divf %164, %167 : vector<8x8xf32>
    %169 = vector.extract_strided_slice %30 {offsets = [0, 3], sizes = [1, 1], strides = [1, 1]} : vector<1x4xf32> to vector<1x1xf32>
    %170 = vector.broadcast %169 : vector<1x1xf32> to vector<8x8xf32>
    %171 = arith.mulf %170, %168 : vector<8x8xf32>
    %172 = arith.addf %157, %171 : vector<8x8xf32>
    %173 = vector.extract_strided_slice %5 {offsets = [0, 24], sizes = [32, 8], strides = [1, 1]} : vector<32x32xf32> to vector<32x8xf32>
    %cst_57 = arith.constant dense<0.000000e+00> : vector<8x32xf32>
    %174 = tpu.matmul %172, %173, %cst_57 {dimension_numbers = #tpu.dot_dimension_numbers<[1], [1], [0], [0], [0, 0, 1, 0], [], []>} : vector<8x8xf32>, vector<32x8xf32>, vector<8x32xf32> -> vector<8x32xf32>
    %175 = arith.addf %139, %174 : vector<8x32xf32>
    %c0_58 = arith.constant 0 : index
    %c0_59 = arith.constant 0 : index
    %c0_60 = arith.constant 0 : index
    %176 = vector.load %arg8[%c0_58, %c0_59, %c0_60] : memref<1x8x32xf32, #tpu.memory_space<vmem>>, vector<1x8x32xf32>
    %177 = vector.shape_cast %176 : vector<1x8x32xf32> to vector<8x32xf32>
    %178 = vector.shape_cast %175 : vector<8x32xf32> to vector<1x8x32xf32>
    tpu.vector_store %arg8[%c0_58, %c0_59, %c0_60], %178 {strides = array<i32>} : memref<1x8x32xf32, #tpu.memory_space<vmem>>, vector<1x8x32xf32>,
    return
  }
  func.func @transform_0(%arg0: i32) -> (i32, i32, i32) {
    %c0_i32 = arith.constant 0 : i32
    %c0_i32_0 = arith.constant 0 : i32
    %c0_i32_1 = arith.constant 0 : i32
    return %arg0, %c0_i32, %c0_i32_0 : i32, i32, i32
  }
  func.func @transform_1(%arg0: i32) -> (i32, i32, i32) {
    %c0_i32 = arith.constant 0 : i32
    %c0_i32_0 = arith.constant 0 : i32
    %c0_i32_1 = arith.constant 0 : i32
    return %arg0, %c0_i32, %c0_i32_0 : i32, i32, i32
  }
  func.func @transform_2(%arg0: i32) -> (i32, i32) {
    %c0_i32 = arith.constant 0 : i32
    %c0_i32_0 = arith.constant 0 : i32
    %c0_i32_1 = arith.constant 0 : i32
    return %c0_i32, %c0_i32_0 : i32, i32
  }
  func.func @transform_3(%arg0: i32) -> (i32, i32) {
    %c0_i32 = arith.constant 0 : i32
    %c0_i32_0 = arith.constant 0 : i32
    %c0_i32_1 = arith.constant 0 : i32
    return %c0_i32, %c0_i32_0 : i32, i32
  }
  func.func @transform_4(%arg0: i32) -> (i32, i32) {
    %c0_i32 = arith.constant 0 : i32
    %c0_i32_0 = arith.constant 0 : i32
    %c0_i32_1 = arith.constant 0 : i32
    return %c0_i32, %c0_i32_0 : i32, i32
  }
  func.func @transform_5(%arg0: i32) -> (i32, i32) {
    %c0_i32 = arith.constant 0 : i32
    %c0_i32_0 = arith.constant 0 : i32
    %c0_i32_1 = arith.constant 0 : i32
    return %c0_i32, %c0_i32_0 : i32, i32
  }
  func.func @transform_6(%arg0: i32) -> (i32, i32) {
    %c0_i32 = arith.constant 0 : i32
    %c0_i32_0 = arith.constant 0 : i32
    %c0_i32_1 = arith.constant 0 : i32
    return %c0_i32, %c0_i32_0 : i32, i32
  }
  func.func @transform_7(%arg0: i32) -> (i32, i32, i32) {
    %c0_i32 = arith.constant 0 : i32
    %c0_i32_0 = arith.constant 0 : i32
    %c0_i32_1 = arith.constant 0 : i32
    return %arg0, %c0_i32, %c0_i32_0 : i32, i32, i32
  }
}

</mosaic_0001>

<bundles_post_ra>
// kernel: tile.19
= control target key start
LH: loop header
LB: loop body
LE: loop exit
PB: predicated region body
PF: predicated region fallthrough
CT: control target
= control target key end

     0   :  { %s22_s0 = inlined_call_operand.vmem [shape: f32[2], index: 0, kind: input, shape index: {}]   ;;  %s23_s1 = inlined_call_operand.vmem [shape: f32[4,2], index: 1, kind: output, shape index: {}]  }
   0x1   :  { %v4_v0 = vld [vmem:[%s22_s0] ss:$0 sm:$0xff] }
   0x2   :  { %5 = vst [vmem:[%s23_s1] sm:$0xf] %v4_v0 }

// kernel: tile.25
= control target key start
LH: loop header
LB: loop body
LE: loop exit
PB: predicated region body
PF: predicated region fallthrough
CT: control target
= control target key end

     0   :  { %vm42_vm0 = vcmask 1047556   ;;  %vm44_vm1 = vcmask 64512   ;;  %s93_s22 = smov 8   ;;  %s94_s25 = smov 16   ;;  %vm54_vm2 = vcmask 261312   ;;  %vm64_vm3 = vcmask 195712   ;;  %s146_s0 = inlined_call_operand.vmem [shape: f32[8,4,8], index: 0, kind: input, shape index: {}]   ;;  %s147_s1 = inlined_call_operand.vmem [shape: f32[8,32], index: 1, kind: output, shape index: {}]  }
   0x1   :  { %v82_v0 = vld [vmem:[%s146_s0 + $0x1c] sm:$0xf]  ;;  %v83_v1 = vld [vmem:[%s146_s0 + $0x18] sm:$0xf]  ;;  %v84_v2 = vld [vmem:[%s146_s0 + $0x14] sm:$0xf] }
   0x2   :  { %8 = vst [vmem:[#allocation0 + $0x38] sm:$0xf] %v82_v0  ;;  %13 = vst [vmem:[#allocation0 + $0x30] sm:$0xf] %v83_v1  ;;  %v85_v3 = vld [vmem:[%s146_s0 + $0x10] sm:$0xf] }
   0x3   :  { %18 = vst [vmem:[#allocation0 + $0x28] sm:$0xf] %v84_v2  ;;  %v86_v4 = vld [vmem:[%s146_s0 + $0xc] sm:$0xf]  ;;  %v87_v5 = vld [vmem:[%s146_s0 + $0x8] sm:$0xf] }
   0x4   :  { %23 = vst [vmem:[#allocation0 + $0x20] sm:$0xf] %v85_v3  ;;  %28 = vst [vmem:[#allocation0 + $0x18] sm:$0xf] %v86_v4  ;;  %v88_v6 = vld [vmem:[%s146_s0 + $0x4] sm:$0xf] }
   0x5   :  { %33 = vst [vmem:[#allocation0 + $0x10] sm:$0xf] %v87_v5  ;;  %v38_v7 = vld [vmem:[%s146_s0] sm:$0xf]  ;;  %37 = vst [vmem:[#allocation0 + $0x8] sm:$0xf] %v88_v6 }
   0x6   :  { %39 = vst [vmem:[#allocation0] sm:$0xf] %v38_v7  ;;  %s92_s0 = smov 24   ;;  %vm74_vm4 = vcmask 130112  }
   0xb   :  { %v49_v8 = vld [vmem:[#allocation0 + $0x3] ss:$8 sm:$0xf0]   ;;  %v59_v9 = vld [vmem:[#allocation0 + $0x2] ss:$8 sm:$0xf0]  }
   0xc   :  { %v69_v14 = vld [vmem:[#allocation0 + $0x1] ss:$8 sm:$0xf0]   ;;  %v41_v17 = vld [vmem:[#allocation0] ss:$8 sm:$0xf0]  }
   0xd   :  { %v47_v10 = vld [vmem:[#allocation0 + $0x3] ss:$8 sm:$0xf]   ;;  %v57_v11 = vld [vmem:[#allocation0 + $0x2] ss:$8 sm:$0xf]  }
   0xe   :  { %v51_v12 = vsel %vm42_vm0, %v49_v8, %v47_v10  ;;  %v67_v13 = vld [vmem:[#allocation0 + $0x1] ss:$8 sm:$0xf]   ;;  %v40_v16 = vld [vmem:[#allocation0] ss:$8 sm:$0xf]   ;;  %v61_v18 = vsel %vm42_vm0, %v59_v9, %v57_v11 }
   0xf   :  { %52 = vrot.lane.b32.xlu0 %v51_v12, %s92_s0  ;;  %v71_v15 = vsel %vm42_vm0, %v69_v14, %v67_v13  ;;  %v43_v19 = vsel %vm42_vm0, %v41_v17, %v40_v16 }
  0x10   :  { %72 = vrot.lane.b32.xlu1 %v71_v15, %s93_s22  ;;  %45 = vst.msk [vmem:[%s147_s1] sm:$0xff] %vm44_vm1, %v43_v19  }
  0x13   :  { %62 = vrot.lane.b32.xlu0 %v61_v18, %s94_s25 }
  0x81   :  { %v53_v20 = vpop.permute.xlu0 %52  }
  0x82   :  { %55 = vst.msk [vmem:[%s147_s1] sm:$0xff] %vm54_vm2, %v53_v20   ;;  %v73_v21 = vpop.permute.xlu1 %72  }
  0x85   :  { %v63_v22 = vpop.permute.xlu0 %62  }
  0x86   :  { %65 = vst.msk [vmem:[%s147_s1] sm:$0xff] %vm64_vm3, %v63_v22  }
  0x87   :  { %75 = vst.msk [vmem:[%s147_s1] sm:$0xff] %vm74_vm4, %v73_v21  }

// kernel: attention_forward.1
= control target key start
LH: loop header
LB: loop body
LE: loop exit
PB: predicated region body
PF: predicated region fallthrough
CT: control target
= control target key end

     0   :  { %12 = vsyncpa [#allocation3], 0  ;;  %s3483_s0 = inlined_call_operand.vmem [shape: f32[2,8,32], index: 0, kind: input, shape index: {}]   ;;  %s3484_s1 = inlined_call_operand.vmem [shape: f32[2,8,32], index: 1, kind: input, shape index: {}]   ;;  %s3485_s2 = inlined_call_operand.vmem [shape: f32[160,32], index: 2, kind: input, shape index: {}]   ;;  %s3486_s3 = inlined_call_operand.vmem [shape: f32[32,32], index: 3, kind: input, shape index: {}]   ;;  %s3487_s4 = inlined_call_operand.vmem [shape: f32[8,32], index: 4, kind: input, shape index: {}]   ;;  %s3488_s5 = inlined_call_operand.vmem [shape: f32[8,32], index: 5, kind: input, shape index: {}]   ;;  %s3489_s6 = inlined_call_operand.vmem [shape: f32[1,4], index: 6, kind: input, shape index: {}]   ;;  %s3490_s7 = inlined_call_operand.hbm [shape: f32[2,8,32], index: 7, kind: output, shape index: {}]  }
   0x1   :  { %14 = vsyncpa [#allocation3 + $0x1], 0  ;;  %s2969_s24 = smov 0   ;;  %s2971_s25 = smov 0  }
   0x2   :  { %s2973_s26 = smov 0   ;;  %s2975_s27 = smov 0  }
   0x3 LB: > { %s2990_s28 = sadd.s32 4294967295, %s2907_s27   ;;  %s2335_s29 = sadd.s32 4294967294, %s2907_s27   ;;  %s2907_s27 = sphi %s2975_s27, %s3500_s27   ;;  %s2903_s26 = sphi %s2973_s26, %s3499_s26   ;;  %s2899_s25 = sphi %s2971_s25, %s3498_s25   ;;  %s2895_s24 = sphi %s2969_s24, %s3497_s24  }
   0x4   : > { %s2994_s30 = sadd.s32 1, %s2907_s27   ;;  %s184_s8 = sadd.s32 1, %s2903_s26 }
   0x5   : > { %s181_s9 = ssub.s32 %s2907_s27, %s2994_s30  ;;  %p194_p0 = scmp.ne.s32.totalorder %s2903_s26, %s2899_s25 }
   0x6   : > { %p182_p1 = scmp.eq.s32.totalorder %s181_s9, 0  ;;  %p195_p2 = scmp.eq.s32.totalorder %s2990_s28, 1 }
   0x7   : > { %p200_p3 = scmp.ne.s32.totalorder %s2899_s25, %s2895_s24  ;;  %p201_p4 = scmp.eq.s32.totalorder %s2335_s29, 1 }
   0x8   : > { %s3005_s10 = scalar_select %p182_p1, %s2903_s26, %s184_s8  }
   0x9   : > { %p3007_p5 = por %p195_p2, %p194_p0  ;;  %p3011_p6 = por %p201_p4, %p200_p3 }
   0xa   : > { %p2338_p7 = scmp.ge.s32.totalorder %s2907_s27, 1  ;;  %p248_p8 = scmp.lt.s32.totalorder %s2907_s27, 3 }
   0xc   : > { %p249_p9 = pnand %p2338_p7, %p248_p8 }
   0xd   : > { %v293_v0 = vld [vmem:[%s3485_s2] sm:$0xff] (!%p249_p9)  ;;  %v294_v1 = vld [vmem:[%s3485_s2 + $0x8] sm:$0xff] (!%p249_p9)  ;;  %vm317_vm0 = vcmask (!%p249_p9), 261120   ;;  %v2909_v2 = vmov (!%p249_p9), 0.0|0.0   ;;  %v2910_v6 = vmov (!%p249_p9), 0.0   ;;  %vm2911_vm2 = vmmov (!%p249_p9), 0  }
   0xe   : > { %252 = sbr.rel (%p249_p9) target bundleno = 2858 (0xb2a), region = 48  ;;  %2624 = vmatprep.subr.bf16.mxu0 (!%p249_p9), %v2909_v2  ;;  %v2625_v3 = vpack.c.bf16 (!%p249_p9), %v294_v1, %v293_v0  ;;  %vm3026_vm1 = vmpackc.low (!%p249_p9), %vm317_vm0, %vm317_vm0  ;;  %v297_v5 = vld [vmem:[%s3485_s2 + $0x20] sm:$0xff] (!%p249_p9)  ;;  %445 = vmatprep.mubr.f32.mxu0 (!%p249_p9), %v2910_v6  ;;  %v298_v7 = vld [vmem:[%s3485_s2 + $0x28] sm:$0xff] (!%p249_p9)  ;;  %s2912_s17 = smov (!%p249_p9), 32   ;;  %vm560_vm3 = vcmask (!%p249_p9), 64512   ;;  %v550_v56 = vlaneseq (!%p249_p9) }
   0xf   : > { %2664 = vmatprep.subr.bf16.mxu1 (!%p249_p9), %v2909_v2  ;;  %2497 = vmatprep.mubr.msk.f32.mxu1 (!%p249_p9), %vm2911_vm2, %v2910_v6  ;;  %v2633_v8 = vpack.c.bf16 (!%p249_p9), %v298_v7, %v297_v5  ;;  %v295_v9 = vld [vmem:[%s3485_s2 + $0x10] sm:$0xff] (!%p249_p9)  ;;  %v296_v10 = vld [vmem:[%s3485_s2 + $0x18] sm:$0xff] (!%p249_p9)  ;;  %v3055_v12 = vld [vmem:[%s3487_s4] sm:$0xff] (!%p249_p9)  ;;  %s2913_s20 = smov (!%p249_p9), 96   ;;  %p283_p10 = scmp.lt.s32.totalorder (!%p249_p9), %s2990_s28, 1 }
  0x10   : > { %2627 = vmatpush1.bf16.xpose.msk.msra.mxu0 (!%p249_p9), %vm3026_vm1, %v2625_v3  ;;  %v2629_v11 = vpack.c.bf16 (!%p249_p9), %v296_v10, %v295_v9  ;;  %v299_v13 = vld [vmem:[%s3485_s2 + $0x30] sm:$0xff] (!%p249_p9)  ;;  %v300_v14 = vld [vmem:[%s3485_s2 + $0x38] sm:$0xff] (!%p249_p9)  ;;  %540 = vrot.lane.b32.xlu0 (!%p249_p9), %v3055_v12, %s2912_s17  ;;  %v3068_v15 = vld [vmem:[%s3488_s5] sm:$0xff] (!%p249_p9)  ;;  %v3200_v57 = vshrl.u32 (!%p249_p9), %v550_v56, 7  ;;  %v3202_v58 = vand.u32 (!%p249_p9), 127, %v550_v56  ;;  %s2918_s22 = smov (!%p249_p9), 72  }
  0x11   : > { %2628 = vmatprep.subr.bf16.mxu0 (!%p249_p9), %v2909_v2  ;;  %2667 = vmatpush3.bf16.xpose.msk.msra.mxu1 (!%p249_p9), %vm3026_vm1, %v2633_v8  ;;  %v2637_v16 = vpack.c.bf16 (!%p249_p9), %v300_v14, %v299_v13  ;;  %v301_v17 = vld [vmem:[%s3485_s2 + $0x40] sm:$0xff] (!%p249_p9)  ;;  %v302_v18 = vld [vmem:[%s3485_s2 + $0x48] sm:$0xff] (!%p249_p9)  ;;  %v303_v20 = vld [vmem:[%s3485_s2 + $0x50] sm:$0xff] (!%p249_p9)  ;;  %s2919_s23 = smov (!%p249_p9), 104   ;;  %s2920_s29 = smov (!%p249_p9), 56  }
  0x12   : > { %2668 = vmatprep.subr.bf16.mxu1 (!%p249_p9), %v2909_v2  ;;  %v2641_v19 = vpack.c.bf16 (!%p249_p9), %v302_v18, %v301_v17  ;;  %v304_v21 = vld [vmem:[%s3485_s2 + $0x58] sm:$0xff] (!%p249_p9)  ;;  %v305_v24 = vld [vmem:[%s3485_s2 + $0x60] sm:$0xff] (!%p249_p9)  ;;  %v306_v25 = vld [vmem:[%s3485_s2 + $0x68] sm:$0xff] (!%p249_p9)  ;;  %vm554_vm4 = vcmp.ge.s32.totalorder (!%p249_p9), %v3200_v57, %v3202_v58  ;;  %s2921_s8 = smov (!%p249_p9), 88   ;;  %s2922_s9 = smov (!%p249_p9), 120  }
  0x13   : > { %v2645_v22 = vpack.c.bf16 (!%p249_p9), %v304_v21, %v303_v20  ;;  %v2649_v26 = vpack.c.bf16 (!%p249_p9), %v306_v25, %v305_v24  ;;  %v307_v27 = vld [vmem:[%s3485_s2 + $0x70] sm:$0xff] (!%p249_p9)  ;;  %v308_v28 = vld [vmem:[%s3485_s2 + $0x78] sm:$0xff] (!%p249_p9)  ;;  %v309_v30 = vld [vmem:[%s3485_s2 + $0x80] sm:$0xff] (!%p249_p9) }
  0x14   : > { %529 = vrot.lane.b32.xlu0 (!%p249_p9), %v3068_v15, %s2913_s20  ;;  %v2653_v29 = vpack.c.bf16 (!%p249_p9), %v308_v28, %v307_v27  ;;  %v310_v31 = vld [vmem:[%s3485_s2 + $0x88] sm:$0xff] (!%p249_p9)  ;;  %v311_v33 = vld [vmem:[%s3485_s2 + $0x90] sm:$0xff] (!%p249_p9)  ;;  %v312_v34 = vld [vmem:[%s3485_s2 + $0x98] sm:$0xff] (!%p249_p9) }
  0x15   : > { %s3098_s15 = scalar_select %p283_p10, %s2990_s28, 1  ;;  %v2657_v32 = vpack.c.bf16 %v310_v31, %v309_v30  ;;  %v2661_v35 = vpack.c.bf16 %v312_v34, %v311_v33  ;;  %vm3385_vm5 = vmpackc.low %vm560_vm3, %vm560_vm3 }
  0x17   : > { %s2340_s16 = sshll.u32 %s3098_s15, 3  ;;  %s2914_s15 = smov 64  }
  0x18   : > { %2631 = vmatpush1.bf16.xpose.msk.msra.mxu0 %vm3026_vm1, %v2629_v11  ;;  %s290_s21 = scalar_lea.vmem %s3484_s1, %s2340_s16  ;;  %s286_s19 = scalar_lea.vmem %s3483_s0, %s2340_s16 }
  0x19   : > { %2632 = vmatprep.subr.bf16.mxu0 %v2909_v2  ;;  %2671 = vmatpush3.bf16.xpose.msk.msra.mxu1 %vm3026_vm1, %v2637_v16  ;;  %v292_v23 = vld [vmem:[%s290_s21] sm:$0xff]  ;;  %s2916_s16 = smov 112   ;;  %s2917_s21 = smov 48  }
  0x1a   : > { %2672 = vmatprep.subr.bf16.mxu1 %v2909_v2  ;;  %v291_v36 = vld [vmem:[%s286_s19] sm:$0xff] }
  0x20   : > { %2635 = vmatpush1.bf16.xpose.msk.msra.mxu0 %vm3026_vm1, %v2633_v8 }
  0x21   : > { %2636 = vmatprep.subr.bf16.mxu0 %v2909_v2  ;;  %2675 = vmatpush3.bf16.xpose.msk.msra.mxu1 %vm3026_vm1, %v2641_v19 }
  0x22   : > { %2676 = vmatprep.subr.bf16.mxu1 %v2909_v2 }
  0x28   : > { %2639 = vmatpush1.bf16.xpose.msk.msra.mxu0 %vm3026_vm1, %v2637_v16 }
  0x29   : > { %2640 = vmatprep.subr.bf16.mxu0 %v2909_v2  ;;  %2679 = vmatpush3.bf16.xpose.msk.msra.mxu1 %vm3026_vm1, %v2645_v22 }
  0x2a   : > { %2510 = vmatprep.subr.mxu1 %v2910_v6 }
  0x30   : > { %2643 = vmatpush1.bf16.xpose.msk.msra.mxu0 %vm3026_vm1, %v2641_v19  ;;  %2498 = vmatmul.mubr.msk.f32.vlgmr.msra.gmra.mrb[0].mxu1 %vm317_vm0, %v292_v23 }
  0x31   : > { %2644 = vmatprep.subr.bf16.mxu0 %v2909_v2  ;;  %2512 = vmatprep.mubr.msk.f32.mxu1 %vm2911_vm2, %v2910_v6 }
  0x38   : > { %2647 = vmatpush1.bf16.xpose.msk.msra.mxu0 %vm3026_vm1, %v2645_v22 }
  0x39   : > { %2648 = vmatprep.subr.bf16.mxu0 %v2909_v2 }
  0x40   : > { %2651 = vmatpush1.bf16.xpose.msk.msra.mxu0 %vm3026_vm1, %v2649_v26 }
  0x41   : > { %2652 = vmatprep.subr.bf16.mxu0 %v2909_v2 }
  0x48   : > { %2655 = vmatpush1.bf16.xpose.msk.msra.mxu0 %vm3026_vm1, %v2653_v29 }
  0x49   : > { %2656 = vmatprep.subr.bf16.mxu0 %v2909_v2 }
  0x50   : > { %2659 = vmatpush1.bf16.xpose.msk.msra.mxu0 %vm3026_vm1, %v2657_v32 }
  0x51   : > { %2660 = vmatprep.subr.bf16.mxu0 %v2909_v2 }
  0x58   : > { %2663 = vmatpush1.bf16.xpose.msk.msra.mxu0 %vm3026_vm1, %v2661_v35 }
  0x59   : > { %2500 = vmatprep.subr.mxu0 %v2910_v6 }
  0x5f   : > { %2362 = vmatmul.mubr.msk.f32.vlgmr.msra.gmra.mrb[0].mxu0 %vm317_vm0, %v291_v36 }
  0x60   : > { %2502 = vmatprep.mubr.msk.f32.mxu0 %vm2911_vm2, %v2910_v6 }
  0x82   : > { %v541_v39 = vpop.permute.xlu0 %540 }
  0x86   : > { %v530_v43 = vpop.permute.xlu0 %529 }
 0x103   : > { %v3165_v37 = vpop.f32.mrb[0].mxu1 }
 0x104   : > { %2511 = vmatpush3.xpose.msk.msra.mxu1 %vm560_vm3, %v3165_v37  ;;  %v2499_v38 = vpop.f32.mrb[1].mxu1 }
 0x105   : > { %2515 = vmatprep.subr.mxu1 %v2910_v6 }
 0x132   : > { %v3170_v40 = vpop.f32.mrb[0].mxu0 }
 0x133   : > { %v449_v41 = vpop.f32.mrb[1].mxu0  ;;  %v532_v44 = vmul.f32 %v530_v43, %v3170_v40  ;;  %v543_v45 = vmul.f32 %v541_v39, %v3170_v40  ;;  %v527_v48 = vmul.f32 %v3055_v12, %v3170_v40 }
 0x134   : > { %v544_v42 = vmul.f32 %v3068_v15, %v449_v41 }
 0x136   : > { %546 = vrot.lane.b32.xlu1 %v544_v42, %s2912_s17 }
 0x13a   : > { %534 = vrot.lane.b32.xlu1 %v532_v44, %s2912_s17  ;;  %s2915_s17 = smov 80  }
 0x1a8   : > { %v547_v46 = vpop.permute.xlu1 %546 }
 0x1a9   : > { %v3177_v47 = vadd.f32 %v547_v46, %v543_v45 }
 0x1ab   : > { %558 = vrot.lane.b32.xlu0 %v3177_v47, %s2913_s20 }
 0x1ac   : > { %v535_v49 = vpop.permute.xlu1 %534 }
 0x1ad   : > { %v537_v50 = vadd.f32 %v535_v49, %v527_v48 }
 0x1af   : > { %v3183_v51 = vmul.f32 0.35355338, %v537_v50  ;;  %644 = vrot.lane.b32.xlu0 %v3170_v40, %s2914_s15 }
 0x1b1   : > { %2513 = vmatmul.mubr.msk.f32.vlgmr.msra.gmra.mrb[2].mxu1 %vm560_vm3, %v3183_v51 }
 0x1b2   : > { %2517 = vmatprep.mubr.msk.f32.mxu1 %vm2911_vm2, %v2910_v6 }
 0x1b3   : > { %1405 = vrot.lane.b32.xlu0 %v3177_v47, %s2915_s17 }
 0x1b7   : > { %1403 = vrot.lane.b32.xlu0 %v3183_v51, %s2916_s16 }
 0x21d   : > { %v559_v52 = vpop.permute.xlu0 %558 }
 0x21e   : > { %2501 = vmatpush3.xpose.msk.msra.mxu0 %vm560_vm3, %v559_v52 }
 0x21f   : > { %2505 = vmatprep.subr.mxu0 %v2910_v6 }
 0x221   : > { %v645_v53 = vpop.permute.xlu0 %644  ;;  %2503 = vmatmul.mubr.msk.f32.vlgmr.msra.gmra.mrb[2].mxu0 %vm560_vm3, %v3183_v51 }
 0x222   : > { %2506 = vmatpush3.msra.mxu0 %v645_v53  ;;  %2507 = vmatprep.mubr.msk.f32.mxu0 %vm2911_vm2, %v2910_v6 }
 0x223   : > { %2562 = vmatprep.subr.mxu0 %v2910_v6 }
 0x225   : > { %v1406_v4 = vpop.permute.xlu0 %1405 }
 0x229   : > { %v1404_v7 = vpop.permute.xlu0 %1403 }
 0x284   : > { %v794_v54 = vpop.f32.mrb[2].mxu1 }
 0x285   : > { %v2514_v55 = vpop.f32.mrb[3].mxu1  ;;  %v798_v63 = vsel %vm560_vm3, %v794_v54, -inf }
 0x2f4   : > { %v632_v59 = vpop.f32.mrb[2].mxu0 }
 0x2f5   : > { %v636_v60 = vsel %vm554_vm4, %v632_v59, -1e+30  ;;  %v2504_v61 = vpop.f32.mrb[3].mxu0 }
 0x2f6   : > { %v637_v62 = vsel %vm560_vm3, %v636_v60, -inf }
 0x2f7   : > { %638 = vmax.xlane.f32.xlu1 %v637_v62 }
 0x308   : > { %1488 = vrot.lane.b32.xlu1 %v3170_v40, %s2917_s21 }
 0x32c   : > { %799 = vmax.xlane.f32.xlu1 %v798_v63 }
 0x33d   : > { %1649 = vrot.lane.b32.xlu1 %v3165_v37, %s2915_s17 }
 0x341   : > { %1828 = vrot.lane.b32.xlu1 %v3177_v47, %s2918_s22 }
 0x345   : > { %1826 = vrot.lane.b32.xlu1 %v3183_v51, %s2919_s23 }
 0x349   : > { %981 = vrot.lane.b32.xlu1 %v3170_v40, %s2920_s29 }
 0x384   : > { %v639_v0 = vpop.xlane.xlu1 %638 }
 0x385   : > { %v640_v1 = vsub.f32 %v636_v60, %v639_v0 }
 0x387   : > { %v641_v3 = vmul.f32 1.442695, %v640_v1 }
 0x388   : > { %v1489_v8 = vpop.permute.xlu1 %1488 }
 0x389   : > { %2811 = vpow2.f32 %v641_v3  ;;  %v2924_v3 = vmov 1  }
 0x38a   : > { %2781 = vset.pattern.permute.xlu0 %v2924_v3 }
 0x393   : > { %v3218_v5 = vpop.eup %2811 }
 0x394   : > { %2508 = vmatmul.mubr.msk.f32.vlgmr.msra.gmra.mrb[4].mxu0 %vm560_vm3, %v3218_v5 }
 0x395   : > { %2563 = vmatpush3.xpose.msk.msra.mxu0 %vm560_vm3, %v1406_v4  ;;  %2564 = vmatprep.mubr.msk.f32.mxu0 %vm2911_vm2, %v2910_v6 }
 0x396   : > { %2567 = vmatprep.subr.mxu0 %v2910_v6 }
 0x398   : > { %2565 = vmatmul.mubr.msk.f32.vlgmr.msra.gmra.mrb[6].mxu0 %vm560_vm3, %v1404_v7 }
 0x399   : > { %2568 = vmatpush3.msra.mxu0 %v1489_v8  ;;  %2569 = vmatprep.mubr.msk.f32.mxu0 %vm2911_vm2, %v2910_v6 }
 0x39a   : > { %2572 = vmatprep.subr.mxu0 %v2910_v6 }
 0x3b9   : > { %v800_v15 = vpop.xlane.xlu1 %799 }
 0x3ba   : > { %v801_v16 = vsub.f32 %v794_v54, %v800_v15 }
 0x3bc   : > { %v802_v17 = vmul.f32 1.442695, %v801_v16 }
 0x3bd   : > { %v1650_v19 = vpop.permute.xlu1 %1649 }
 0x3be   : > { %2813 = vpow2.f32 %v802_v17  ;;  %v720_v17 = vsel %vm560_vm3, %v3218_v5, 0.0 }
 0x3c1   : > { %v1829_v23 = vpop.permute.xlu1 %1828 }
 0x3c5   : > { %v3251_v27 = vpop.permute.xlu1 %1826 }
 0x3c8   : > { %v3244_v25 = vpop.eup %2813 }
 0x3c9   : > { %v982_v30 = vpop.permute.xlu1 %981 }
 0x467   : > { %v3230_v9 = vpop.f32.mrb[4].mxu0 }
 0x468   : > { %v2509_v10 = vpop.f32.mrb[5].mxu0 }
 0x46b   : > { %v1477_v11 = vpop.f32.mrb[6].mxu0 }
 0x46c   : > { %v1481_v12 = vsel %vm554_vm4, %v1477_v11, -1e+30  ;;  %v2566_v13 = vpop.f32.mrb[7].mxu0 }
 0x46d   : > { %v1482_v14 = vsel %vm560_vm3, %v1481_v12, -inf }
 0x46e   : > { %1483 = vmax.xlane.f32.xlu0 %v1482_v14 }
 0x484   : > { %1569 = vrot.lane.b32.xlu0 %v3165_v37, %s2916_s16 }
 0x488   : > { %804 = vrot.lane.b32.xlu0 %v3165_v37, %s2913_s20  ;;  %s2923_s20 = smov 40  }
 0x48c   : > { %898 = vrot.lane.b32.xlu0 %v3177_v47, %s2921_s8 }
 0x490   : > { %896 = vrot.lane.b32.xlu0 %v3183_v51, %s2922_s9 }
 0x4fb   : > { %v1484_v18 = vpop.xlane.xlu0 %1483 }
 0x4fc   : > { %v1485_v20 = vsub.f32 %v1481_v12, %v1484_v18  ;;  %v555_v18 = vld [vmem:[%s3489_s6] sm:$0x1] }
 0x4fe   : > { %v1486_v21 = vmul.f32 1.442695, %v1485_v20 }
 0x4ff   : > { %v1570_v22 = vpop.permute.xlu0 %1569 }
 0x500   : > { %2815 = vpow2.f32 %v1486_v21 }
 0x503   : > { %v805_v24 = vpop.permute.xlu0 %804 }
 0x504   : > { %2516 = vmatpush3.msra.mxu1 %v805_v24 }
 0x505   : > { %2518 = vmatmul.mubr.msk.f32.vlgmr.msra.gmra.mrb[4].mxu1 %vm560_vm3, %v3244_v25  ;;  %2520 = vmatprep.subr.mxu1 %v2910_v6 }
 0x506   : > { %2522 = vmatprep.mubr.msk.f32.mxu1 %vm2911_vm2, %v2910_v6 }
 0x507   : > { %v899_v26 = vpop.permute.xlu0 %898 }
 0x50a   : > { %v3253_v28 = vpop.eup %2815 }
 0x50b   : > { %2521 = vmatpush3.xpose.msk.msra.mxu1 %vm560_vm3, %v899_v26  ;;  %2570 = vmatmul.mubr.msk.f32.vlgmr.msra.gmra.mrb[8].mxu0 %vm560_vm3, %v3253_v28  ;;  %v897_v29 = vpop.permute.xlu0 %896 }
 0x50c   : > { %2573 = vmatpush3.xpose.msk.msra.mxu0 %vm560_vm3, %v1570_v22  ;;  %2525 = vmatprep.subr.mxu1 %v2910_v6  ;;  %v2925_v22 = vmov 0  }
 0x50d   : > { %2574 = vmatprep.mubr.msk.f32.mxu0 %vm2911_vm2, %v2910_v6  ;;  %2577 = vmatprep.subr.mxu0 %v2910_v6 }
 0x50e   : > { %2523 = vmatmul.mubr.msk.f32.vlgmr.msra.gmra.mrb[6].mxu1 %vm560_vm3, %v897_v29 }
 0x50f   : > { %2526 = vmatpush3.msra.mxu1 %v982_v30  ;;  %2575 = vmatmul.mubr.msk.f32.vlgmr.msra.gmra.mrb[10].mxu0 %vm560_vm3, %v1404_v7 }
 0x510   : > { %2578 = vmatpush3.msra.mxu0 %v1650_v19  ;;  %2579 = vmatprep.mubr.msk.f32.mxu0 %vm2911_vm2, %v2910_v6  ;;  %v888_v19 = vsub.s32 0, %v3200_v57 }
 0x511   : > { %2593 = vmatprep.subr.mxu0 %v2910_v6  ;;  %2527 = vmatprep.mubr.msk.f32.mxu1 %vm2911_vm2, %v2910_v6 }
 0x512   : > { %2530 = vmatprep.subr.mxu1 %v2910_v6 }
 0x5d8   : > { %v3271_v31 = vpop.f32.mrb[4].mxu1 }
 0x5d9   : > { %v2519_v32 = vpop.f32.mrb[5].mxu1 }
 0x5de   : > { %v3273_v33 = vpop.f32.mrb[8].mxu0 }
 0x5df   : > { %v2571_v34 = vpop.f32.mrb[9].mxu0 }
 0x5e0   : > { %v2926_v34 = vmov 2  }
 0x5e1   : > { %v970_v35 = vpop.f32.mrb[6].mxu1  ;;  %2793 = vset.pattern.permute.xlu1 %v2926_v34 }
 0x5e2   : > { %v2524_v36 = vpop.f32.mrb[7].mxu1  ;;  %v1639_v38 = vpop.f32.mrb[10].mxu0  ;;  %v974_v42 = vsel %vm554_vm4, %v970_v35, -1e+30 }
 0x5e3   : > { %v2576_v39 = vpop.f32.mrb[11].mxu0  ;;  %v1643_v41 = vsel %vm560_vm3, %v1639_v38, -inf  ;;  %v975_v43 = vsel %vm560_vm3, %v974_v42, -inf  ;;  %v2927_v36 = vmov 3  }
 0x5e4   : > { %1644 = vmax.xlane.f32.xlu0 %v1643_v41  ;;  %v3358_v39 = vld [vmem:[%s3486_s3 + $0x8] sm:$0xff] }
 0x5e8   : > { %976 = vmax.xlane.f32.xlu0 %v975_v43  ;;  %v3370_v43 = vld [vmem:[%s3486_s3 + $0x18] sm:$0xff] }
 0x5fe   : > { %1062 = vrot.lane.b32.xlu0 %v3165_v37, %s2922_s9 }
 0x602   : > { %1911 = vrot.lane.b32.xlu0 %v3170_v40, %s2923_s20 }
 0x606   : > { %1992 = vrot.lane.b32.xlu0 %v3165_v37, %s2919_s23 }
 0x671   : > { %v1645_v44 = vpop.xlane.xlu0 %1644 }
 0x672   : > { %v1646_v45 = vsub.f32 %v1639_v38, %v1645_v44  ;;  %v3353_v38 = vld [vmem:[%s3486_s3] sm:$0xff] }
 0x673   : > { %v2776_v41 = vpack.i.bf16 %v3358_v39, %v3353_v38 }
 0x674   : > { %v1647_v46 = vmul.f32 1.442695, %v1646_v45  ;;  %v880_v45 = vsel %vm560_vm3, %v3244_v25, 0.0 }
 0x675   : > { %v977_v47 = vpop.xlane.xlu0 %976 }
 0x676   : > { %2817 = vpow2.f32 %v1647_v46  ;;  %v978_v48 = vsub.f32 %v974_v42, %v977_v47  ;;  %v3365_v42 = vld [vmem:[%s3486_s3 + $0x10] sm:$0xff]  ;;  %v1564_v46 = vsel %vm560_vm3, %v3253_v28, 0.0 }
 0x677   : > { %v2794_v44 = vpack.i.bf16 %v3370_v43, %v3365_v42 }
 0x678   : > { %v979_v49 = vmul.f32 1.442695, %v978_v48 }
 0x679   : > { %v1063_v50 = vpop.permute.xlu0 %1062 }
 0x67a   : > { %2819 = vpow2.f32 %v979_v49 }
 0x67d   : > { %v1912_v52 = vpop.permute.xlu0 %1911 }
 0x680   : > { %v3285_v51 = vpop.eup %2817 }
 0x681   : > { %2580 = vmatmul.mubr.msk.f32.vlgmr.msra.gmra.mrb[12].mxu0 %vm560_vm3, %v3285_v51  ;;  %v1993_v58 = vpop.permute.xlu0 %1992 }
 0x682   : > { %2594 = vmatpush3.xpose.msk.msra.mxu0 %vm560_vm3, %v1829_v23  ;;  %2595 = vmatprep.mubr.msk.f32.mxu0 %vm2911_vm2, %v2910_v6  ;;  %v1725_v23 = vsel %vm560_vm3, %v3285_v51, 0.0 }
 0x683   : > { %2598 = vmatprep.subr.mxu0 %v2910_v6 }
 0x684   : > { %v3293_v40 = vpop.eup %2819 }
 0x685   : > { %2528 = vmatmul.mubr.msk.f32.vlgmr.msra.gmra.mrb[8].mxu1 %vm560_vm3, %v3293_v40  ;;  %2596 = vmatmul.mubr.msk.f32.vlgmr.msra.gmra.mrb[14].mxu0 %vm560_vm3, %v3251_v27  ;;  %v1057_v35 = vsel %vm560_vm3, %v3293_v40, 0.0 }
 0x686   : > { %2531 = vmatpush3.xpose.msk.msra.mxu1 %vm560_vm3, %v1063_v50  ;;  %2599 = vmatpush3.msra.mxu0 %v1912_v52 }
 0x687   : > { %2532 = vmatprep.mubr.msk.f32.mxu1 %vm2911_vm2, %v2910_v6  ;;  %2535 = vmatprep.subr.mxu1 %v2910_v6 }
 0x688   : > { %2600 = vmatprep.mubr.msk.f32.mxu0 %vm2911_vm2, %v2910_v6  ;;  %2603 = vmatprep.subr.mxu0 %v2910_v6 }
 0x689   : > { %2533 = vmatmul.mubr.msk.f32.vlgmr.msra.gmra.mrb[10].mxu1 %vm560_vm3, %v897_v29 }
 0x68a   : > { %2537 = vmatprep.mubr.msk.f32.mxu1 %vm2911_vm2, %v2910_v6 }
 0x754   : > { %v3309_v53 = vpop.f32.mrb[12].mxu0 }
 0x755   : > { %v2581_v54 = vpop.f32.mrb[13].mxu0 }
 0x758   : > { %v3311_v55 = vpop.f32.mrb[8].mxu1  ;;  %v1900_v56 = vpop.f32.mrb[14].mxu0 }
 0x759   : > { %v1904_v59 = vsel %vm554_vm4, %v1900_v56, -1e+30  ;;  %v2529_v60 = vpop.f32.mrb[9].mxu1  ;;  %v2597_v61 = vpop.f32.mrb[15].mxu0 }
 0x75a   : > { %v1905_v62 = vsel %vm560_vm3, %v1904_v59, -inf }
 0x75b   : > { %1906 = vmax.xlane.f32.xlu1 %v1905_v62 }
 0x75c   : > { %v1132_v63 = vpop.f32.mrb[10].mxu1 }
 0x75d   : > { %v2534_v0 = vpop.f32.mrb[11].mxu1  ;;  %v1136_v1 = vsel %vm560_vm3, %v1132_v63, -inf }
 0x75e   : > { %1137 = vmax.xlane.f32.xlu0 %v1136_v1 }
 0x76c   : > { %1142 = vrot.lane.b32.xlu1 %v3165_v37, %s2921_s8 }
 0x774   : > { %2072 = vrot.lane.b32.xlu0 %v3165_v37, %s2918_s22 }
 0x7e8   : > { %v1907_v4 = vpop.xlane.xlu1 %1906 }
 0x7e9   : > { %v1908_v7 = vsub.f32 %v1904_v59, %v1907_v4 }
 0x7eb   : > { %v1909_v8 = vmul.f32 1.442695, %v1908_v7  ;;  %v1138_v10 = vpop.xlane.xlu0 %1137 }
 0x7ec   : > { %v1139_v11 = vsub.f32 %v1132_v63, %v1138_v10  ;;  %v1143_v12 = vpop.permute.xlu1 %1142 }
 0x7ed   : > { %2821 = vpow2.f32 %v1909_v8  ;;  %2536 = vmatpush3.msra.mxu1 %v1143_v12 }
 0x7ee   : > { %v1140_v13 = vmul.f32 1.442695, %v1139_v11  ;;  %2680 = vmatprep.subr.bf16.mxu1 %v2909_v2 }
 0x7ef   : > { %v2073_v16 = vpop.permute.xlu0 %2072 }
 0x7f0   : > { %2823 = vpow2.f32 %v1140_v13 }
 0x7f1   : > { %2825 = vtanh.f32 %v555_v18 }
 0x7f7   : > { %v2822_v14 = vpop.eup %2821 }
 0x7f8   : > { %2601 = vmatmul.mubr.msk.f32.vlgmr.msra.gmra.mrb[16].mxu0 %vm560_vm3, %v2822_v14  ;;  %v1987_v5 = vsel %vm560_vm3, %v2822_v14, 0.0 }
 0x7f9   : > { %2604 = vmatpush3.xpose.msk.msra.mxu0 %vm560_vm3, %v1993_v58  ;;  %2605 = vmatprep.mubr.msk.f32.mxu0 %vm2911_vm2, %v2910_v6 }
 0x7fa   : > { %v2824_v37 = vpop.eup %2823  ;;  %2608 = vmatprep.subr.mxu0 %v2910_v6 }
 0x7fb   : > { %2538 = vmatmul.mubr.msk.f32.vlgmr.msra.gmra.mrb[12].mxu1 %vm560_vm3, %v2824_v37  ;;  %v1218_v15 = vsel %vm560_vm3, %v2824_v37, 0.0  ;;  %v2826_v20 = vpop.eup %2825 }
 0x7fc   : > { %1219 = vadd.xlane.f32.xlu0 %v1218_v15  ;;  %2606 = vmatmul.mubr.msk.f32.vlgmr.msra.gmra.mrb[18].mxu0 %vm560_vm3, %v3251_v27  ;;  %v889_v21 = vrot.slane %v2826_v20, %v888_v19  ;;  %v2689_v15 = vpack.c.bf16 %v3358_v39, %v3353_v38 }
 0x7fd   : > { %2609 = vmatpush3.msra.mxu0 %v2073_v16  ;;  %2610 = vmatprep.mubr.msk.f32.mxu0 %vm2911_vm2, %v2910_v6 }
 0x7fe   : > { %2548 = vmatprep.mubr.msk.f32.mxu1 %vm2911_vm2, %v2910_v6 }
 0x800   : > { %721 = vadd.xlane.f32.xlu0 %v720_v17 }
 0x816   : > { %1224 = vperm.xlu0 %2781, %v889_v21  }
 0x81a   : > { %2787 = vset.pattern.permute.xlu0 %v2925_v22 }
 0x835   : > { %1726 = vadd.xlane.f32.xlu0 %v1725_v23 }
 0x84b   : > { %891 = vperm.xlu0 %2787, %v889_v21  }
 0x84f   : > { %2810 = vset.pattern.permute.xlu0 %v2927_v36 }
 0x86a   : > { %1988 = vadd.xlane.f32.xlu0 %v1987_v5 }
 0x880   : > { %2795 = vrot.lane.b32.xlu0 %v2794_v44, %s2916_s16 }
 0x889   : > { %v1220_v47 = vpop.xlane.xlu0 %1219 }
 0x88a   : > { %2827 = vrcp.f32 %v1220_v47 }
 0x88d   : > { %v722_v59 = vpop.xlane.xlu0 %721 }
 0x894   : > { %v2828_v56 = vpop.eup %2827 }
 0x895   : > { %v1225_v63 = vpop.permute.xlu0 %1224 }
 0x8c2   : > { %v1727_v12 = vpop.xlane.xlu0 %1726 }
 0x8ca   : > { %v892_v37 = vpop.permute.xlu0 %891 }
 0x8cb   : > { %v3345_v24 = vpop.f32.mrb[16].mxu0 }
 0x8cc   : > { %v2602_v26 = vpop.f32.mrb[17].mxu0 }
 0x8ce   : > { %v1214_v27 = vpop.f32.mrb[12].mxu1 }
 0x8cf   : > { %v2539_v29 = vpop.f32.mrb[13].mxu1  ;;  %v2062_v30 = vpop.f32.mrb[18].mxu0  ;;  %v1222_v60 = vmul.f32 %v2828_v56, %v1214_v27 }
 0x8d0   : > { %v2607_v57 = vpop.f32.mrb[19].mxu0  ;;  %v2066_v32 = vsel %vm560_vm3, %v2062_v30, -inf }
 0x8d1   : > { %2067 = vmax.xlane.f32.xlu1 %v2066_v32  ;;  %v1227_v0 = vmul.f32 %v1225_v63, %v1222_v60 }
 0x8d5   : > { %1058 = vadd.xlane.f32.xlu1 %v1057_v35 }
 0x8e6   : > { %2777 = vrot.lane.b32.xlu1 %v2776_v41, %s2922_s9 }
 0x8f7   : > { %v1989_v19 = vpop.xlane.xlu0 %1988 }
 0x8fb   : > { %v2796_v23 = vpop.permute.xlu0 %2795 }
 0x8fc   : > { %v2798_v29 = vunpack.i.h.bf16 %v2796_v23 }
 0x90a   : > { %881 = vadd.xlane.f32.xlu1 %v880_v45 }
 0x91b   : > { %2783 = vrot.lane.b32.xlu1 %v2794_v44, %s2922_s9  ;;  %s2417_s9 = sshll.u32 %s2990_s28, 7  ;;  %s2928_s28 = smov [#allocation2]  }
 0x91c   : > { %s3440_s19 = scalar_lea.hbm %s3490_s7, %s2417_s9  ;;  %s2849_s21 = sshll.u32 %s2928_s28, 4  ;;  %s2850_s21 = int_to_ptr.vmem [resolvable:$false] %s2849_s21 }
 0x91d   : > { %s2851_s22 = scalar_lea.vmem %s2850_s21, 256 }
 0x93f   : > { %1565 = vadd.xlane.f32.xlu1 %v1564_v46 }
 0x950   : > { %2789 = vrot.lane.b32.xlu1 %v2776_v41, %s2916_s16  ;;  %s280_s16 = sand.u32 1, %s2899_s25  }
 0x951   : > { %s2251_s15 = scalar_lea.sflag [#allocation3], %s280_s16 }
 0x954   : > { %1731 = vperm.xlu1 %2793, %v889_v21  }
 0x958   : > { %2800 = vrot.lane.b32.xlu1 %v2776_v41, %s2919_s23 }
 0x959   : > { %2804 = vset.pattern.permute.xlu1 %v2927_v36 }
 0x95c   : > { %2154 = vperm.xlu1 %2804, %v889_v21  }
 0x95e   : > { %v2068_v48 = vpop.xlane.xlu1 %2067 }
 0x95f   : > { %v2069_v49 = vsub.f32 %v2062_v30, %v2068_v48  ;;  %v2797_v30 = vunpack.i.l.bf16 %v2796_v23 }
 0x961   : > { %v2070_v50 = vmul.f32 1.442695, %v2069_v49  ;;  %v2701_v36 = vpack.c.bf16 %v2798_v29, %v2797_v30 }
 0x962   : > { %v1059_v25 = vpop.xlane.xlu1 %1058 }
 0x963   : > { %2829 = vpow2.f32 %v2070_v50 }
 0x964   : > { %2831 = vrcp.f32 %v1059_v25 }
 0x965   : > { %2833 = vrcp.f32 %v722_v59 }
 0x966   : > { %v2778_v51 = vpop.permute.xlu1 %2777 }
 0x967   : > { %v2780_v40 = vunpack.i.h.bf16 %v2778_v51  ;;  %v2779_v52 = vunpack.i.l.bf16 %v2778_v51 }
 0x969   : > { %v2681_v54 = vpack.c.bf16 %v2780_v40, %v2779_v52 }
 0x96b   : > { %2683 = vmatpush3.bf16.xpose.msk.msra.mxu1 %vm3385_vm5, %v2681_v54 }
 0x96c   : > { %2684 = vmatprep.subr.bf16.mxu1 %v2909_v2 }
 0x96d   : > { %v2830_v61 = vpop.eup %2829 }
 0x96e   : > { %v2832_v62 = vpop.eup %2831  ;;  %2611 = vmatmul.mubr.msk.f32.vlgmr.msra.gmra.mrb[20].mxu0 %vm560_vm3, %v2830_v61  ;;  %v2148_v58 = vsel %vm560_vm3, %v2830_v61, 0.0 }
 0x96f   : > { %v1061_v1 = vmul.f32 %v2832_v62, %v3311_v55  ;;  %v2834_v13 = vpop.eup %2833 }
 0x970   : > { %v724_v16 = vmul.f32 %v2834_v13, %v3230_v9 }
 0x971   : > { %v1228_v3 = vadd.f32 %v1227_v0, %v1061_v1 }
 0x980   : > { %2149 = vadd.xlane.f32.xlu1 %v2148_v58 }
 0x991   : > { %2806 = vrot.lane.b32.xlu1 %v2794_v44, %s2919_s23  ;;  %s2339_s23 = sshll.u32 %s280_s16, 3 }
 0x992   : > { %s282_s20 = scalar_lea.vmem [#allocation2], %s2339_s23 }
 0x993   : > { %s2264_s13 = sshll.u32 %s282_s20, 4  ;;  %s3442_s13 = int_to_ptr.vmem [resolvable:$true] %s2264_s13 }
 0x994   : > { %s2845_s17 = scalar_lea.vmem %s3442_s13, 128  ;;  %p2852_p0 = scmp.lt.s32.totalorder %s3442_s13, %s2850_s21 }
 0x995   : > { %p2846_p11 = scmp.ne.s32.totalorder %s3442_s13, %s2845_s17  ;;  %p2853_p1 = scmp.lt.s32.totalorder %s2851_s22, %s2845_s17 }
 0x997   : > { %v882_v4 = vpop.xlane.xlu1 %881  ;;  %p2847_p12 = pnand %p2846_p11, %p3007_p5  ;;  %p2854_p2 = por %p2853_p1, %p2852_p0 }
 0x998   : > { %2835 = vrcp.f32 %v882_v4 }
 0x999   : > { %2837 = vrcp.f32 %v1727_v12  ;;  %p2848_p13 = pneg %p2847_p12 }
 0x99b   : > { %v2784_v7 = vpop.permute.xlu1 %2783  ;;  %p2855_p3 = pnand %p2854_p2, %p2848_p13 }
 0x99c   : > { %v2786_v8 = vunpack.i.h.bf16 %v2784_v7  ;;  %v2785_v10 = vunpack.i.l.bf16 %v2784_v7 }
 0x99e   : > { %v2685_v11 = vpack.c.bf16 %v2786_v8, %v2785_v10 }
 0x9a0   : > { %2687 = vmatpush3.bf16.xpose.msk.msra.mxu1 %vm3385_vm5, %v2685_v11 }
 0x9a1   : > { %2688 = vmatprep.subr.bf16.mxu1 %v2909_v2 }
 0x9a2   : > { %v2836_v55 = vpop.eup %2835 }
 0x9a3   : > { %v884_v14 = vmul.f32 %v2836_v55, %v3271_v31  ;;  %v2693_v31 = vpack.c.bf16 %v3370_v43, %v3365_v42  ;;  %v2838_v5 = vpop.eup %2837 }
 0x9a4   : > { %v1729_v57 = vmul.f32 %v2838_v5, %v3309_v53 }
 0x9a5   : > { %v894_v17 = vmul.f32 %v892_v37, %v884_v14 }
 0x9a7   : > { %2549 = vmatmul.mubr.msk.f32.vlgmr.msra.gmra.mrb[14].mxu1 %vm560_vm3, %v1228_v3  ;;  %v895_v18 = vadd.f32 %v894_v17, %v724_v16 }
 0x9a8   : > { %2691 = vmatpush3.bf16.xpose.msk.msra.mxu1 %vm3385_vm5, %v2689_v15  ;;  %2559 = vmatprep.mubr.msk.f32.mxu1 %vm2911_vm2, %v2910_v6 }
 0x9a9   : > { %2692 = vmatprep.subr.bf16.mxu1 %v2909_v2 }
 0x9b0   : > { %2695 = vmatpush3.bf16.xpose.msk.msra.mxu1 %vm3385_vm5, %v2693_v31 }
 0x9b1   : > { %2696 = vmatprep.subr.bf16.mxu1 %v2909_v2 }
 0x9b7   : > { %2560 = vmatmul.mubr.msk.f32.vlgmr.msra.gmra.mrb[14].mxu1 %vm560_vm3, %v895_v18 }
 0x9b8   : > { %2590 = vmatprep.mubr.msk.f32.mxu1 %vm2911_vm2, %v2910_v6 }
 0x9cc   : > { %v1566_v9 = vpop.xlane.xlu1 %1565 }
 0x9cd   : > { %2839 = vrcp.f32 %v1566_v9 }
 0x9ce   : > { %2841 = vrcp.f32 %v1989_v19 }
 0x9d0   : > { %v2790_v20 = vpop.permute.xlu1 %2789 }
 0x9d1   : > { %v2792_v21 = vunpack.i.h.bf16 %v2790_v20  ;;  %v2791_v22 = vunpack.i.l.bf16 %v2790_v20 }
 0x9d3   : > { %v2697_v26 = vpack.c.bf16 %v2792_v21, %v2791_v22 }
 0x9d4   : > { %v1732_v27 = vpop.permute.xlu1 %1731 }
 0x9d5   : > { %2699 = vmatpush3.bf16.xpose.msk.msra.mxu1 %vm3385_vm5, %v2697_v26  ;;  %v1734_v35 = vmul.f32 %v1732_v27, %v1729_v57 }
 0x9d6   : > { %2700 = vmatprep.subr.bf16.mxu1 %v2909_v2 }
 0x9d7   : > { %v2840_v32 = vpop.eup %2839 }
 0x9d8   : > { %v1568_v34 = vmul.f32 %v2840_v32, %v3273_v33  ;;  %v2801_v39 = vpop.permute.xlu1 %2800  ;;  %v2842_v48 = vpop.eup %2841 }
 0x9d9   : > { %v2803_v41 = vunpack.i.h.bf16 %v2801_v39  ;;  %v2802_v42 = vunpack.i.l.bf16 %v2801_v39 }
 0x9da   : > { %v1735_v38 = vadd.f32 %v1734_v35, %v1568_v34 }
 0x9db   : > { %v2705_v43 = vpack.c.bf16 %v2803_v41, %v2802_v42 }
 0x9dc   : > { %v2155_v33 = vpop.permute.xlu1 %2154 }
 0x9dd   : > { %2703 = vmatpush3.bf16.xpose.msk.msra.mxu1 %vm3385_vm5, %v2701_v36 }
 0x9de   : > { %2704 = vmatprep.subr.bf16.mxu1 %v2909_v2 }
 0x9e4   : > { %2591 = vmatmul.mubr.msk.f32.vlgmr.msra.gmra.mrb[14].mxu1 %vm560_vm3, %v1735_v38 }
 0x9e5   : > { %2707 = vmatpush3.bf16.xpose.msk.msra.mxu1 %vm3385_vm5, %v2705_v43  ;;  %2621 = vmatprep.mubr.msk.f32.mxu1 %vm2911_vm2, %v2910_v6 }
 0x9e6   : > { %2708 = vmatprep.subr.bf16.mxu1 %v2909_v2  ;;  %v1991_v2 = vmul.f32 %v2842_v48, %v3345_v24 }
 0xa0d   : > { %v2150_v53 = vpop.xlane.xlu1 %2149 }
 0xa0e   : > { %2843 = vrcp.f32 %v2150_v53 }
 0xa11   : > { %v2807_v44 = vpop.permute.xlu1 %2806 }
 0xa12   : > { %v2809_v45 = vunpack.i.h.bf16 %v2807_v44  ;;  %v2808_v46 = vunpack.i.l.bf16 %v2807_v44 }
 0xa14   : > { %v2709_v47 = vpack.c.bf16 %v2809_v45, %v2808_v46 }
 0xa16   : > { %2711 = vmatpush3.bf16.xpose.msk.msra.mxu1 %vm3385_vm5, %v2709_v47 }
 0xa18   : > { %v2844_v49 = vpop.eup %2843 }
 0xa41   : > { %v2144_v50 = vpop.f32.mrb[20].mxu0 }
 0xa42   : > { %v2152_v25 = vmul.f32 %v2844_v49, %v2144_v50  ;;  %v2612_v6 = vpop.f32.mrb[21].mxu0 }
 0xa44   : > { %v2157_v51 = vmul.f32 %v2155_v33, %v2152_v25 }
 0xa46   : > { %v2158_v40 = vadd.f32 %v2157_v51, %v1991_v2 }
 0xa48   : > { %2622 = vmatmul.mubr.msk.f32.vlgmr.msra.gmra.mrb[14].mxu1 %vm560_vm3, %v2158_v40 }
 0xb1b   : > { %v2244_v24 = vpop.f32.mrb[14].mxu1 }
 0xb1c   : > { %2249 = vst.msk [vmem:[%s282_s20] sm:$0xff] %vm317_vm0, %v2244_v24  ;;  %v2623_v52 = vpop.f32.mrb[15].mxu1 }
 0xb1d   : > { %2858 = shalt.err (!%p2855_p3)
}
 0xb1e   : > { %s2859_s29 = scalar_lea.hbm %s3440_s19, 128  ;;  %s2863_s23 = scalar_lea.hbm %s3490_s7, 256 }
 0xb1f   : > { %p2860_p4 = scmp.ne.s32.totalorder %s3440_s19, %s2859_s29  ;;  %p2864_p9 = scmp.lt.u32.totalorder %s3440_s19, %s3490_s7 }
 0xb20   : > { %p2865_p10 = scmp.lt.u32.totalorder %s2863_s23, %s2859_s29  ;;  %p2867_p12 = scmp.lt.u32.totalorder %s2859_s29, %s3440_s19 }
 0xb21   : > { %p2861_p7 = pnand %p2860_p4, %p3007_p5 }
 0xb22   : > { %p2866_p11 = por %p2865_p10, %p2864_p9 }
 0xb23   : > { %p2862_p8 = pneg %p2861_p7 }
 0xb24   : > { %p2868_p13 = por %p2867_p12, %p2866_p11 }
 0xb26   : > { %p2869_p0 = pnand %p2868_p13, %p2862_p8 }
 0xb28   : > { %2872 = shalt.err (!%p2869_p0)
}
 0xb29   : > { %2718 = dma.vmem_to_hbm [thread:$0]  (%p3007_p5), %s3442_s13, 128, %s3440_s19, %s2251_s15  }
 0xb2a PF: > { %p2724_p1 = scmp.ge.s32.totalorder %s2907_s27, 2  ;;  %s2276_s14 = sand.u32 1, %s2895_s24  }
 0xb2b   : > { %s2277_s18 = scalar_lea.sflag [#allocation3], %s2276_s14 }
 0xb2c   : > { %p2721_p2 = pnand %p2724_p1, %p3011_p6 }
 0xb2e   : > { %2890 = dma.done.wait (!%p2721_p2), %s2277_s18, 128  }
 0xb2f   : > { %2892 = vsyncadd (!%p2721_p2), %s2277_s18, 4294967168  ;;  %p17_p3 = scmp.ge.s32.totalorder %s2994_s30, 4   ;;  %s3497_s24 = smov %s2899_s25 }
 0xb30   : > { %s3498_s25 = smov %s2903_s26  ;;  %s3499_s26 = smov %s3005_s10 }
 0xb31   : > { %s3500_s27 = smov %s2994_s30  ;;  %19 = sbr.rel (!%p17_p3) target bundleno = 3 (0x3), region = 86 }
 0xb38   :  { %2282 = vsyncpa [#allocation3], 1 }
 0xb39   :  { %2284 = vsyncpa [#allocation3 + $0x1], 1 }

</bundles_post_ra>
